<compile_context>
chip_gen: v7x
topology: tpu7x:2x2x1
jax: 0.10.0
libtpu: 0.0.40
codegen_flags: <defaults>
</compile_context>

<pallas_src>
import functools
import math

import jax
import jax.numpy as jnp
from jax.experimental import pallas as pl
from jax.experimental.pallas import tpu as pltpu

NUM_LAYERS = 8          # 7 x (WSLinear + LeakyReLU) + 1 final WSLinear
LEAKY_SLOPE = 0.2
PIXELNORM_EPS = 1e-8
LANE = 128
CHAIN_ROWS = 16         # tile granularity: 2 chains x 8 sublanes (bf16-friendly)
NUM_CHAINS = 2


def _round_up(x, m):
    return (x + m - 1) // m * m


def init_gmapping_params(key, z_dim, w_dim, dtype=jnp.float32):
    """WSLinear-style params: weight (in, out) ~ N(0,1); runtime scale sqrt(2/fan_in).

    Biases are drawn small-random so the correctness check exercises the
    bias-add path (the torch module initializes them to zero)."""
    weights, biases = [], []
    in_dim = z_dim
    for _ in range(NUM_LAYERS):
        key, kw, kb = jax.random.split(key, 3)
        weights.append(jax.random.normal(kw, (in_dim, w_dim), dtype=dtype))
        biases.append(0.1 * jax.random.normal(kb, (w_dim,), dtype=dtype))
        in_dim = w_dim
    return weights, biases


def prepare_gmapping_params(weights, biases, param_dtype=jnp.bfloat16):
    """One-time parameter prep:
      * fold the WSLinear scale sqrt(2/fan_in) into the weights,
      * zero-pad feature dims to a multiple of 128 (lane-dense),
      * stack layers 1..7 into one (7, Wp, Wp) slab, all biases into (8, 1, Wp),
      * cast weights to bf16 (MXU-native); biases stay f32 (added post-accumulate).
    Zero padding keeps the math exact (padded lanes/rows/cols/bias are 0)."""
    z_dim = weights[0].shape[0]
    w_dim = weights[0].shape[1]
    zp = _round_up(z_dim, LANE)
    wp = _round_up(w_dim, LANE)

    def pad_w(w, rows, cols):
        w = w.astype(jnp.float32)
        return jnp.pad(w, ((0, rows - w.shape[0]), (0, cols - w.shape[1])))

    scaled = [weights[i].astype(jnp.float32) * math.sqrt(2.0 / weights[i].shape[0])
              for i in range(NUM_LAYERS)]
    w0 = pad_w(scaled[0], zp, wp).astype(param_dtype)
    wrest = jnp.stack([pad_w(scaled[i], wp, wp) for i in range(1, NUM_LAYERS)]
                      ).astype(param_dtype)
    b = jnp.stack([jnp.pad(biases[i].astype(jnp.float32).reshape(1, -1),
                           ((0, 0), (0, wp - w_dim)))
                   for i in range(NUM_LAYERS)])          # (8, 1, Wp), f32
    return w0, wrest, b, z_dim, w_dim


def _gmapping_kernel(noise_ref, w0_ref, wrest_ref, b_ref, out_ref, *,
                     z_dim, n_chains):
    # PixelNorm in f32. Padded feature lanes are zero, so the sum over the padded
    # width equals the sum over the real z_dim features; divide by the REAL z_dim.
    x = noise_ref[...].astype(jnp.float32)
    x = x * jax.lax.rsqrt(
        jnp.sum(x * x, axis=-1, keepdims=True) * (1.0 / z_dim) + PIXELNORM_EPS)

    tb = x.shape[0]
    half = tb // n_chains

    # Two data-independent chains, layers statically unrolled and interleaved:
    # while chain A drains its MXU result and runs bias/LeakyReLU/cast on the
    # VPU, chain B's matmul can occupy the MXU (and vice versa).
    hs = [x[c * half:(c + 1) * half].astype(jnp.bfloat16) for c in range(n_chains)]
    ys = [None] * n_chains
    for i in range(NUM_LAYERS):
        w = w0_ref[...] if i == 0 else wrest_ref[i - 1]     # bf16 (in, Wp)
        bi = b_ref[i]                                        # f32 (1, Wp)
        for c in range(n_chains):
            ys[c] = jnp.dot(hs[c], w, preferred_element_type=jnp.float32) + bi
        if i < NUM_LAYERS - 1:
            for c in range(n_chains):
                a = ys[c]
                a = jnp.maximum(a, LEAKY_SLOPE * a)          # LeakyReLU(0.2), f32
                hs[c] = a.astype(jnp.bfloat16)

    broadcast = out_ref.ndim == 3          # dlatent_broadcast fused into the store
    for c in range(n_chains):
        y = ys[c].astype(out_ref.dtype)                      # (half, Wp), lane-dense
        lo, hi = c * half, (c + 1) * half
        if broadcast:
            lcount = out_ref.shape[1]
            out_ref[lo:hi, :, :] = jnp.broadcast_to(
                y[:, None, :], (half, lcount, y.shape[-1]))
        else:
            out_ref[lo:hi, :] = y


def gmapping_forward(noise, prepared, dlatent_broadcast=None, block_batch=1024,
                     out_dtype=None):
    w0, wrest, b, z_dim, w_dim = prepared
    B, Z = noise.shape
    assert Z == z_dim, (Z, z_dim)
    zp, wp = w0.shape
    out_dtype = jnp.dtype(out_dtype) if out_dtype is not None else noise.dtype
    l_out = dlatent_broadcast if dlatent_broadcast is not None else 1

    # ---- generation-aware VMEM budget (v7x: 64 MiB, v5e/v6e: 128 MiB) ----
    try:
        vmem_cap = int(pltpu.get_tpu_info().vmem_capacity_bytes)
    except Exception:
        vmem_cap = 64 * 1024 * 1024     # conservative fallback (v7x per-core)
    budget = int(vmem_cap * 0.85)

    in_isz = jnp.dtype(noise.dtype).itemsize
    out_isz = out_dtype.itemsize
    # weights/biases are single-buffered (grid-invariant) -> counted once.
    weight_bytes = (w0.size * w0.dtype.itemsize + wrest.size * wrest.dtype.itemsize
                    + b.size * b.dtype.itemsize)

    def est_bytes(tb):
        io = 2 * (tb * zp * in_isz + tb * l_out * wp * out_isz)  # dbl-buffered I/O
        inter = 6 * tb * max(zp, wp) * 4                         # in-kernel temps
        return weight_bytes + io + inter

    # ---- batch tiling: balanced tiles, >=2 grid steps when the batch allows it
    # (so v7x's second TensorCore isn't idle), tile a multiple of 16 rows
    # (two 8-row chains; also safe for bf16 I/O sublane packing). ----
    b16 = _round_up(B, CHAIN_ROWS)
    n_tiles = max(pl.cdiv(b16, block_batch),
                  2 if b16 >= 2 * CHAIN_ROWS else 1)
    tb = _round_up(pl.cdiv(b16, n_tiles), CHAIN_ROWS)
    while tb > CHAIN_ROWS and est_bytes(tb) > budget:
        tb = max(CHAIN_ROWS, _round_up(tb // 2, CHAIN_ROWS))
    b_pad = tb * pl.cdiv(b16, tb)
    grid = (b_pad // tb,)

    # ---- pad only when needed (skip extra HBM passes in the aligned case) ----
    if b_pad == B and zp == Z:
        noise_p = noise
    else:
        noise_p = jnp.pad(noise, ((0, b_pad - B), (0, zp - Z)))

    if dlatent_broadcast is not None:
        out_shape = jax.ShapeDtypeStruct((b_pad, l_out, wp), out_dtype)
        out_spec = pl.BlockSpec((tb, l_out, wp), lambda i: (i, 0, 0))
    else:
        out_shape = jax.ShapeDtypeStruct((b_pad, wp), out_dtype)
        out_spec = pl.BlockSpec((tb, wp), lambda i: (i, 0))

    # Always set the scoped VMEM limit (no default-dependent gate), capped safely
    # below the device's physical capacity.
    vmem_limit = int(min(vmem_cap - 4 * 1024 * 1024,
                         max(est_bytes(tb) * 1.4, 32 * 1024 * 1024)))

    kernel = functools.partial(_gmapping_kernel, z_dim=z_dim, n_chains=NUM_CHAINS)

    def run(single_buffer_weights):
        if single_buffer_weights:
            wkw = dict(pipeline_mode=pl.Buffered(1))   # grid-invariant: 1 buffer
        else:
            wkw = {}
        return pl.pallas_call(
            kernel,
            out_shape=out_shape,
            grid=grid,
            in_specs=[
                pl.BlockSpec((tb, zp), lambda i: (i, 0)),            # batch-tiled
                pl.BlockSpec(w0.shape, lambda i: (0, 0), **wkw),     # resident
                pl.BlockSpec(wrest.shape, lambda i: (0, 0, 0), **wkw),
                pl.BlockSpec(b.shape, lambda i: (0, 0, 0), **wkw),
            ],
            out_specs=out_spec,
            compiler_params=pltpu.CompilerParams(
                dimension_semantics=("parallel",),
                vmem_limit_bytes=vmem_limit,
            ),
        )(noise_p, w0, wrest, b)

    try:
        out = run(single_buffer_weights=True)
    except Exception:
        # Fallback for toolchains without pipeline_mode / Buffered(1) support.
        out = run(single_buffer_weights=False)

    if dlatent_broadcast is not None:
        if b_pad != B or wp != w_dim:
            out = out[:B, :, :w_dim]
    else:
        if b_pad != B or wp != w_dim:
            out = out[:B, :w_dim]
    return out


if __name__ == "__main__":
    key = jax.random.PRNGKey(0)
    z_dim, w_dim, batch = 32, 32, 8
    dlatent_broadcast = 4

    key, k_noise, k_params = jax.random.split(key, 3)
    noise = jax.random.normal(k_noise, (batch, z_dim), dtype=jnp.float32)
    weights, biases = init_gmapping_params(k_params, z_dim, w_dim)

    prepared = prepare_gmapping_params(weights, biases)   # one-time prep
    out = gmapping_forward(noise, prepared, dlatent_broadcast=dlatent_broadcast)
    out = jax.block_until_ready(out)
    assert out.shape == (batch, dlatent_broadcast, w_dim), out.shape

    # Pure-JAX reference mirroring the kernel's precision strategy
    # (bf16 matmul operands, f32 accumulation / PixelNorm / bias / LeakyReLU).
    def ref_fwd(x):
        h = x.astype(jnp.float32)
        h = h * jax.lax.rsqrt(jnp.mean(h * h, axis=-1, keepdims=True) + PIXELNORM_EPS)
        for i in range(NUM_LAYERS):
            s = math.sqrt(2.0 / weights[i].shape[0])
            wq = (weights[i].astype(jnp.float32) * s).astype(jnp.bfloat16)
            h = jnp.dot(h.astype(jnp.bfloat16), wq,
                        preferred_element_type=jnp.float32) + biases[i].astype(jnp.float32)
            if i < NUM_LAYERS - 1:
                h = jnp.where(h > 0, h, LEAKY_SLOPE * h)
        return jnp.broadcast_to(h[:, None, :], (batch, dlatent_broadcast, w_dim))

    ref = jax.block_until_ready(ref_fwd(noise))
    assert jnp.allclose(out, ref, atol=2e-3, rtol=2e-3), \
        float(jnp.max(jnp.abs(out - ref)))

    print("KERNEL_OK")
</pallas_src>

<mosaic_0001>
module attributes {stable_mosaic.version = 11 : i64} {
  func.func @_gmapping_kernel(%arg0: i32, %arg1: memref<16x128xf32, #tpu.memory_space<vmem>>, %arg2: memref<128x128xbf16, #tpu.memory_space<vmem>>, %arg3: memref<7x128x128xbf16, #tpu.memory_space<vmem>>, %arg4: memref<8x1x128xf32, #tpu.memory_space<vmem>>, %arg5: memref<16x4x128xf32, #tpu.memory_space<vmem>>) attributes {dimension_semantics = [#tpu.dimension_semantics<parallel>], iteration_bounds = array<i64: 1>, scalar_prefetch = 0 : i64, scratch_operands = 0 : i64, tpu.core_type = #tpu.core_type<tc>, window_params = [{transform_indices = @transform_0, window_bounds = array<i64: 16, 128>}, {pipeline_mode = #tpu.pipeline_mode<synchronous>, transform_indices = @transform_1, window_bounds = array<i64: 128, 128>}, {pipeline_mode = #tpu.pipeline_mode<synchronous>, transform_indices = @transform_2, window_bounds = array<i64: 7, 128, 128>}, {pipeline_mode = #tpu.pipeline_mode<synchronous>, transform_indices = @transform_3, window_bounds = array<i64: 8, 1, 128>}, {transform_indices = @transform_4, window_bounds = array<i64: 16, 4, 128>}]} {
    %c0 = arith.constant 0 : index
    %c0_0 = arith.constant 0 : index
    %0 = vector.load %arg1[%c0, %c0_0] : memref<16x128xf32, #tpu.memory_space<vmem>>, vector<16x128xf32>
    %1 = arith.mulf %0, %0 : vector<16x128xf32>
    %cst = arith.constant dense<0.000000e+00> : vector<16xf32>
    %2 = vector.multi_reduction <add>, %1, %cst [1] : vector<16x128xf32> to vector<16xf32>
    %3 = vector.shape_cast %2 : vector<16xf32> to vector<16x1xf32>
    %cst_1 = arith.constant 3.125000e-02 : f32
    %4 = vector.broadcast %cst_1 : f32 to vector<16x1xf32>
    %5 = arith.mulf %3, %4 : vector<16x1xf32>
    %cst_2 = arith.constant 9.99999993E-9 : f32
    %6 = vector.broadcast %cst_2 : f32 to vector<16x1xf32>
    %7 = arith.addf %5, %6 : vector<16x1xf32>
    %8 = math.rsqrt %7 : vector<16x1xf32>
    %9 = vector.broadcast %8 : vector<16x1xf32> to vector<16x128xf32>
    %10 = arith.mulf %0, %9 : vector<16x128xf32>
    %11 = vector.extract_strided_slice %10 {offsets = [0, 0], sizes = [8, 128], strides = [1, 1]} : vector<16x128xf32> to vector<8x128xf32>
    %12 = arith.truncf %11 : vector<8x128xf32> to vector<8x128xbf16>
    %13 = vector.extract_strided_slice %10 {offsets = [8, 0], sizes = [8, 128], strides = [1, 1]} : vector<16x128xf32> to vector<8x128xf32>
    %14 = arith.truncf %13 : vector<8x128xf32> to vector<8x128xbf16>
    %c0_3 = arith.constant 0 : index
    %c0_4 = arith.constant 0 : index
    %15 = vector.load %arg2[%c0_3, %c0_4] : memref<128x128xbf16, #tpu.memory_space<vmem>>, vector<128x128xbf16>
    %c0_5 = arith.constant 0 : index
    %c0_6 = arith.constant 0 : index
    %c0_7 = arith.constant 0 : index
    %16 = vector.load %arg4[%c0_5, %c0_6, %c0_7] : memref<8x1x128xf32, #tpu.memory_space<vmem>>, vector<1x1x128xf32>
    %17 = vector.shape_cast %16 : vector<1x1x128xf32> to vector<1x128xf32>
    %cst_8 = arith.constant dense<0.000000e+00> : vector<8x128xf32>
    %18 = tpu.matmul %12, %15, %cst_8 {dimension_numbers = #tpu.dot_dimension_numbers<[1], [0], [0], [1], [0, 0, 1, 1], [], []>} : vector<8x128xbf16>, vector<128x128xbf16>, vector<8x128xf32> -> vector<8x128xf32>
    %19 = vector.broadcast %17 : vector<1x128xf32> to vector<8x128xf32>
    %20 = arith.addf %18, %19 : vector<8x128xf32>
    %cst_9 = arith.constant dense<0.000000e+00> : vector<8x128xf32>
    %21 = tpu.matmul %14, %15, %cst_9 {dimension_numbers = #tpu.dot_dimension_numbers<[1], [0], [0], [1], [0, 0, 1, 1], [], []>} : vector<8x128xbf16>, vector<128x128xbf16>, vector<8x128xf32> -> vector<8x128xf32>
    %22 = vector.broadcast %17 : vector<1x128xf32> to vector<8x128xf32>
    %23 = arith.addf %21, %22 : vector<8x128xf32>
    %cst_10 = arith.constant 2.000000e-01 : f32
    %24 = vector.broadcast %cst_10 : f32 to vector<8x128xf32>
    %25 = arith.mulf %24, %20 : vector<8x128xf32>
    %26 = arith.maximumf %20, %25 : vector<8x128xf32>
    %27 = arith.truncf %26 : vector<8x128xf32> to vector<8x128xbf16>
    %cst_11 = arith.constant 2.000000e-01 : f32
    %28 = vector.broadcast %cst_11 : f32 to vector<8x128xf32>
    %29 = arith.mulf %28, %23 : vector<8x128xf32>
    %30 = arith.maximumf %23, %29 : vector<8x128xf32>
    %31 = arith.truncf %30 : vector<8x128xf32> to vector<8x128xbf16>
    %c0_12 = arith.constant 0 : index
    %c0_13 = arith.constant 0 : index
    %c0_14 = arith.constant 0 : index
    %32 = vector.load %arg3[%c0_12, %c0_13, %c0_14] : memref<7x128x128xbf16, #tpu.memory_space<vmem>>, vector<1x128x128xbf16>
    %33 = vector.shape_cast %32 : vector<1x128x128xbf16> to vector<128x128xbf16>
    %c1 = arith.constant 1 : index
    %c0_15 = arith.constant 0 : index
    %c0_16 = arith.constant 0 : index
    %34 = vector.load %arg4[%c1, %c0_15, %c0_16] : memref<8x1x128xf32, #tpu.memory_space<vmem>>, vector<1x1x128xf32>
    %35 = vector.shape_cast %34 : vector<1x1x128xf32> to vector<1x128xf32>
    %cst_17 = arith.constant dense<0.000000e+00> : vector<8x128xf32>
    %36 = tpu.matmul %27, %33, %cst_17 {dimension_numbers = #tpu.dot_dimension_numbers<[1], [0], [0], [1], [0, 0, 1, 1], [], []>} : vector<8x128xbf16>, vector<128x128xbf16>, vector<8x128xf32> -> vector<8x128xf32>
    %37 = vector.broadcast %35 : vector<1x128xf32> to vector<8x128xf32>
    %38 = arith.addf %36, %37 : vector<8x128xf32>
    %cst_18 = arith.constant dense<0.000000e+00> : vector<8x128xf32>
    %39 = tpu.matmul %31, %33, %cst_18 {dimension_numbers = #tpu.dot_dimension_numbers<[1], [0], [0], [1], [0, 0, 1, 1], [], []>} : vector<8x128xbf16>, vector<128x128xbf16>, vector<8x128xf32> -> vector<8x128xf32>
    %40 = vector.broadcast %35 : vector<1x128xf32> to vector<8x128xf32>
    %41 = arith.addf %39, %40 : vector<8x128xf32>
    %cst_19 = arith.constant 2.000000e-01 : f32
    %42 = vector.broadcast %cst_19 : f32 to vector<8x128xf32>
    %43 = arith.mulf %42, %38 : vector<8x128xf32>
    %44 = arith.maximumf %38, %43 : vector<8x128xf32>
    %45 = arith.truncf %44 : vector<8x128xf32> to vector<8x128xbf16>
    %cst_20 = arith.constant 2.000000e-01 : f32
    %46 = vector.broadcast %cst_20 : f32 to vector<8x128xf32>
    %47 = arith.mulf %46, %41 : vector<8x128xf32>
    %48 = arith.maximumf %41, %47 : vector<8x128xf32>
    %49 = arith.truncf %48 : vector<8x128xf32> to vector<8x128xbf16>
    %c1_21 = arith.constant 1 : index
    %c0_22 = arith.constant 0 : index
    %c0_23 = arith.constant 0 : index
    %50 = vector.load %arg3[%c1_21, %c0_22, %c0_23] : memref<7x128x128xbf16, #tpu.memory_space<vmem>>, vector<1x128x128xbf16>
    %51 = vector.shape_cast %50 : vector<1x128x128xbf16> to vector<128x128xbf16>
    %c2 = arith.constant 2 : index
    %c0_24 = arith.constant 0 : index
    %c0_25 = arith.constant 0 : index
    %52 = vector.load %arg4[%c2, %c0_24, %c0_25] : memref<8x1x128xf32, #tpu.memory_space<vmem>>, vector<1x1x128xf32>
    %53 = vector.shape_cast %52 : vector<1x1x128xf32> to vector<1x128xf32>
    %cst_26 = arith.constant dense<0.000000e+00> : vector<8x128xf32>
    %54 = tpu.matmul %45, %51, %cst_26 {dimension_numbers = #tpu.dot_dimension_numbers<[1], [0], [0], [1], [0, 0, 1, 1], [], []>} : vector<8x128xbf16>, vector<128x128xbf16>, vector<8x128xf32> -> vector<8x128xf32>
    %55 = vector.broadcast %53 : vector<1x128xf32> to vector<8x128xf32>
    %56 = arith.addf %54, %55 : vector<8x128xf32>
    %cst_27 = arith.constant dense<0.000000e+00> : vector<8x128xf32>
    %57 = tpu.matmul %49, %51, %cst_27 {dimension_numbers = #tpu.dot_dimension_numbers<[1], [0], [0], [1], [0, 0, 1, 1], [], []>} : vector<8x128xbf16>, vector<128x128xbf16>, vector<8x128xf32> -> vector<8x128xf32>
    %58 = vector.broadcast %53 : vector<1x128xf32> to vector<8x128xf32>
    %59 = arith.addf %57, %58 : vector<8x128xf32>
    %cst_28 = arith.constant 2.000000e-01 : f32
    %60 = vector.broadcast %cst_28 : f32 to vector<8x128xf32>
    %61 = arith.mulf %60, %56 : vector<8x128xf32>
    %62 = arith.maximumf %56, %61 : vector<8x128xf32>
    %63 = arith.truncf %62 : vector<8x128xf32> to vector<8x128xbf16>
    %cst_29 = arith.constant 2.000000e-01 : f32
    %64 = vector.broadcast %cst_29 : f32 to vector<8x128xf32>
    %65 = arith.mulf %64, %59 : vector<8x128xf32>
    %66 = arith.maximumf %59, %65 : vector<8x128xf32>
    %67 = arith.truncf %66 : vector<8x128xf32> to vector<8x128xbf16>
    %c2_30 = arith.constant 2 : index
    %c0_31 = arith.constant 0 : index
    %c0_32 = arith.constant 0 : index
    %68 = vector.load %arg3[%c2_30, %c0_31, %c0_32] : memref<7x128x128xbf16, #tpu.memory_space<vmem>>, vector<1x128x128xbf16>
    %69 = vector.shape_cast %68 : vector<1x128x128xbf16> to vector<128x128xbf16>
    %c3 = arith.constant 3 : index
    %c0_33 = arith.constant 0 : index
    %c0_34 = arith.constant 0 : index
    %70 = vector.load %arg4[%c3, %c0_33, %c0_34] : memref<8x1x128xf32, #tpu.memory_space<vmem>>, vector<1x1x128xf32>
    %71 = vector.shape_cast %70 : vector<1x1x128xf32> to vector<1x128xf32>
    %cst_35 = arith.constant dense<0.000000e+00> : vector<8x128xf32>
    %72 = tpu.matmul %63, %69, %cst_35 {dimension_numbers = #tpu.dot_dimension_numbers<[1], [0], [0], [1], [0, 0, 1, 1], [], []>} : vector<8x128xbf16>, vector<128x128xbf16>, vector<8x128xf32> -> vector<8x128xf32>
    %73 = vector.broadcast %71 : vector<1x128xf32> to vector<8x128xf32>
    %74 = arith.addf %72, %73 : vector<8x128xf32>
    %cst_36 = arith.constant dense<0.000000e+00> : vector<8x128xf32>
    %75 = tpu.matmul %67, %69, %cst_36 {dimension_numbers = #tpu.dot_dimension_numbers<[1], [0], [0], [1], [0, 0, 1, 1], [], []>} : vector<8x128xbf16>, vector<128x128xbf16>, vector<8x128xf32> -> vector<8x128xf32>
    %76 = vector.broadcast %71 : vector<1x128xf32> to vector<8x128xf32>
    %77 = arith.addf %75, %76 : vector<8x128xf32>
    %cst_37 = arith.constant 2.000000e-01 : f32
    %78 = vector.broadcast %cst_37 : f32 to vector<8x128xf32>
    %79 = arith.mulf %78, %74 : vector<8x128xf32>
    %80 = arith.maximumf %74, %79 : vector<8x128xf32>
    %81 = arith.truncf %80 : vector<8x128xf32> to vector<8x128xbf16>
    %cst_38 = arith.constant 2.000000e-01 : f32
    %82 = vector.broadcast %cst_38 : f32 to vector<8x128xf32>
    %83 = arith.mulf %82, %77 : vector<8x128xf32>
    %84 = arith.maximumf %77, %83 : vector<8x128xf32>
    %85 = arith.truncf %84 : vector<8x128xf32> to vector<8x128xbf16>
    %c3_39 = arith.constant 3 : index
    %c0_40 = arith.constant 0 : index
    %c0_41 = arith.constant 0 : index
    %86 = vector.load %arg3[%c3_39, %c0_40, %c0_41] : memref<7x128x128xbf16, #tpu.memory_space<vmem>>, vector<1x128x128xbf16>
    %87 = vector.shape_cast %86 : vector<1x128x128xbf16> to vector<128x128xbf16>
    %c4 = arith.constant 4 : index
    %c0_42 = arith.constant 0 : index
    %c0_43 = arith.constant 0 : index
    %88 = vector.load %arg4[%c4, %c0_42, %c0_43] : memref<8x1x128xf32, #tpu.memory_space<vmem>>, vector<1x1x128xf32>
    %89 = vector.shape_cast %88 : vector<1x1x128xf32> to vector<1x128xf32>
    %cst_44 = arith.constant dense<0.000000e+00> : vector<8x128xf32>
    %90 = tpu.matmul %81, %87, %cst_44 {dimension_numbers = #tpu.dot_dimension_numbers<[1], [0], [0], [1], [0, 0, 1, 1], [], []>} : vector<8x128xbf16>, vector<128x128xbf16>, vector<8x128xf32> -> vector<8x128xf32>
    %91 = vector.broadcast %89 : vector<1x128xf32> to vector<8x128xf32>
    %92 = arith.addf %90, %91 : vector<8x128xf32>
    %cst_45 = arith.constant dense<0.000000e+00> : vector<8x128xf32>
    %93 = tpu.matmul %85, %87, %cst_45 {dimension_numbers = #tpu.dot_dimension_numbers<[1], [0], [0], [1], [0, 0, 1, 1], [], []>} : vector<8x128xbf16>, vector<128x128xbf16>, vector<8x128xf32> -> vector<8x128xf32>
    %94 = vector.broadcast %89 : vector<1x128xf32> to vector<8x128xf32>
    %95 = arith.addf %93, %94 : vector<8x128xf32>
    %cst_46 = arith.constant 2.000000e-01 : f32
    %96 = vector.broadcast %cst_46 : f32 to vector<8x128xf32>
    %97 = arith.mulf %96, %92 : vector<8x128xf32>
    %98 = arith.maximumf %92, %97 : vector<8x128xf32>
    %99 = arith.truncf %98 : vector<8x128xf32> to vector<8x128xbf16>
    %cst_47 = arith.constant 2.000000e-01 : f32
    %100 = vector.broadcast %cst_47 : f32 to vector<8x128xf32>
    %101 = arith.mulf %100, %95 : vector<8x128xf32>
    %102 = arith.maximumf %95, %101 : vector<8x128xf32>
    %103 = arith.truncf %102 : vector<8x128xf32> to vector<8x128xbf16>
    %c4_48 = arith.constant 4 : index
    %c0_49 = arith.constant 0 : index
    %c0_50 = arith.constant 0 : index
    %104 = vector.load %arg3[%c4_48, %c0_49, %c0_50] : memref<7x128x128xbf16, #tpu.memory_space<vmem>>, vector<1x128x128xbf16>
    %105 = vector.shape_cast %104 : vector<1x128x128xbf16> to vector<128x128xbf16>
    %c5 = arith.constant 5 : index
    %c0_51 = arith.constant 0 : index
    %c0_52 = arith.constant 0 : index
    %106 = vector.load %arg4[%c5, %c0_51, %c0_52] : memref<8x1x128xf32, #tpu.memory_space<vmem>>, vector<1x1x128xf32>
    %107 = vector.shape_cast %106 : vector<1x1x128xf32> to vector<1x128xf32>
    %cst_53 = arith.constant dense<0.000000e+00> : vector<8x128xf32>
    %108 = tpu.matmul %99, %105, %cst_53 {dimension_numbers = #tpu.dot_dimension_numbers<[1], [0], [0], [1], [0, 0, 1, 1], [], []>} : vector<8x128xbf16>, vector<128x128xbf16>, vector<8x128xf32> -> vector<8x128xf32>
    %109 = vector.broadcast %107 : vector<1x128xf32> to vector<8x128xf32>
    %110 = arith.addf %108, %109 : vector<8x128xf32>
    %cst_54 = arith.constant dense<0.000000e+00> : vector<8x128xf32>
    %111 = tpu.matmul %103, %105, %cst_54 {dimension_numbers = #tpu.dot_dimension_numbers<[1], [0], [0], [1], [0, 0, 1, 1], [], []>} : vector<8x128xbf16>, vector<128x128xbf16>, vector<8x128xf32> -> vector<8x128xf32>
    %112 = vector.broadcast %107 : vector<1x128xf32> to vector<8x128xf32>
    %113 = arith.addf %111, %112 : vector<8x128xf32>
    %cst_55 = arith.constant 2.000000e-01 : f32
    %114 = vector.broadcast %cst_55 : f32 to vector<8x128xf32>
    %115 = arith.mulf %114, %110 : vector<8x128xf32>
    %116 = arith.maximumf %110, %115 : vector<8x128xf32>
    %117 = arith.truncf %116 : vector<8x128xf32> to vector<8x128xbf16>
    %cst_56 = arith.constant 2.000000e-01 : f32
    %118 = vector.broadcast %cst_56 : f32 to vector<8x128xf32>
    %119 = arith.mulf %118, %113 : vector<8x128xf32>
    %120 = arith.maximumf %113, %119 : vector<8x128xf32>
    %121 = arith.truncf %120 : vector<8x128xf32> to vector<8x128xbf16>
    %c5_57 = arith.constant 5 : index
    %c0_58 = arith.constant 0 : index
    %c0_59 = arith.constant 0 : index
    %122 = vector.load %arg3[%c5_57, %c0_58, %c0_59] : memref<7x128x128xbf16, #tpu.memory_space<vmem>>, vector<1x128x128xbf16>
    %123 = vector.shape_cast %122 : vector<1x128x128xbf16> to vector<128x128xbf16>
    %c6 = arith.constant 6 : index
    %c0_60 = arith.constant 0 : index
    %c0_61 = arith.constant 0 : index
    %124 = vector.load %arg4[%c6, %c0_60, %c0_61] : memref<8x1x128xf32, #tpu.memory_space<vmem>>, vector<1x1x128xf32>
    %125 = vector.shape_cast %124 : vector<1x1x128xf32> to vector<1x128xf32>
    %cst_62 = arith.constant dense<0.000000e+00> : vector<8x128xf32>
    %126 = tpu.matmul %117, %123, %cst_62 {dimension_numbers = #tpu.dot_dimension_numbers<[1], [0], [0], [1], [0, 0, 1, 1], [], []>} : vector<8x128xbf16>, vector<128x128xbf16>, vector<8x128xf32> -> vector<8x128xf32>
    %127 = vector.broadcast %125 : vector<1x128xf32> to vector<8x128xf32>
    %128 = arith.addf %126, %127 : vector<8x128xf32>
    %cst_63 = arith.constant dense<0.000000e+00> : vector<8x128xf32>
    %129 = tpu.matmul %121, %123, %cst_63 {dimension_numbers = #tpu.dot_dimension_numbers<[1], [0], [0], [1], [0, 0, 1, 1], [], []>} : vector<8x128xbf16>, vector<128x128xbf16>, vector<8x128xf32> -> vector<8x128xf32>
    %130 = vector.broadcast %125 : vector<1x128xf32> to vector<8x128xf32>
    %131 = arith.addf %129, %130 : vector<8x128xf32>
    %cst_64 = arith.constant 2.000000e-01 : f32
    %132 = vector.broadcast %cst_64 : f32 to vector<8x128xf32>
    %133 = arith.mulf %132, %128 : vector<8x128xf32>
    %134 = arith.maximumf %128, %133 : vector<8x128xf32>
    %135 = arith.truncf %134 : vector<8x128xf32> to vector<8x128xbf16>
    %cst_65 = arith.constant 2.000000e-01 : f32
    %136 = vector.broadcast %cst_65 : f32 to vector<8x128xf32>
    %137 = arith.mulf %136, %131 : vector<8x128xf32>
    %138 = arith.maximumf %131, %137 : vector<8x128xf32>
    %139 = arith.truncf %138 : vector<8x128xf32> to vector<8x128xbf16>
    %c6_66 = arith.constant 6 : index
    %c0_67 = arith.constant 0 : index
    %c0_68 = arith.constant 0 : index
    %140 = vector.load %arg3[%c6_66, %c0_67, %c0_68] : memref<7x128x128xbf16, #tpu.memory_space<vmem>>, vector<1x128x128xbf16>
    %141 = vector.shape_cast %140 : vector<1x128x128xbf16> to vector<128x128xbf16>
    %c7 = arith.constant 7 : index
    %c0_69 = arith.constant 0 : index
    %c0_70 = arith.constant 0 : index
    %142 = vector.load %arg4[%c7, %c0_69, %c0_70] : memref<8x1x128xf32, #tpu.memory_space<vmem>>, vector<1x1x128xf32>
    %143 = vector.shape_cast %142 : vector<1x1x128xf32> to vector<1x128xf32>
    %cst_71 = arith.constant dense<0.000000e+00> : vector<8x128xf32>
    %144 = tpu.matmul %135, %141, %cst_71 {dimension_numbers = #tpu.dot_dimension_numbers<[1], [0], [0], [1], [0, 0, 1, 1], [], []>} : vector<8x128xbf16>, vector<128x128xbf16>, vector<8x128xf32> -> vector<8x128xf32>
    %145 = vector.broadcast %143 : vector<1x128xf32> to vector<8x128xf32>
    %146 = arith.addf %144, %145 : vector<8x128xf32>
    %cst_72 = arith.constant dense<0.000000e+00> : vector<8x128xf32>
    %147 = tpu.matmul %139, %141, %cst_72 {dimension_numbers = #tpu.dot_dimension_numbers<[1], [0], [0], [1], [0, 0, 1, 1], [], []>} : vector<8x128xbf16>, vector<128x128xbf16>, vector<8x128xf32> -> vector<8x128xf32>
    %148 = vector.broadcast %143 : vector<1x128xf32> to vector<8x128xf32>
    %149 = arith.addf %147, %148 : vector<8x128xf32>
    %150 = vector.shape_cast %146 : vector<8x128xf32> to vector<8x1x128xf32>
    %151 = vector.shape_cast %150 : vector<8x1x128xf32> to vector<8x1x128xf32>
    %152 = vector.broadcast %151 : vector<8x1x128xf32> to vector<8x4x128xf32>
    %c0_73 = arith.constant 0 : index
    %c0_74 = arith.constant 0 : index
    %c0_75 = arith.constant 0 : index
    %153 = vector.load %arg5[%c0_73, %c0_74, %c0_75] : memref<16x4x128xf32, #tpu.memory_space<vmem>>, vector<8x4x128xf32>
    tpu.vector_store %arg5[%c0_73, %c0_74, %c0_75], %152 {strides = array<i32>} : memref<16x4x128xf32, #tpu.memory_space<vmem>>, vector<8x4x128xf32>,
    %154 = vector.shape_cast %149 : vector<8x128xf32> to vector<8x1x128xf32>
    %155 = vector.shape_cast %154 : vector<8x1x128xf32> to vector<8x1x128xf32>
    %156 = vector.broadcast %155 : vector<8x1x128xf32> to vector<8x4x128xf32>
    %c8 = arith.constant 8 : index
    %c0_76 = arith.constant 0 : index
    %c0_77 = arith.constant 0 : index
    %157 = vector.load %arg5[%c8, %c0_76, %c0_77] : memref<16x4x128xf32, #tpu.memory_space<vmem>>, vector<8x4x128xf32>
    tpu.vector_store %arg5[%c8, %c0_76, %c0_77], %156 {strides = array<i32>} : memref<16x4x128xf32, #tpu.memory_space<vmem>>, vector<8x4x128xf32>,
    return
  }
  func.func @transform_0(%arg0: i32) -> (i32, i32) {
    %c0_i32 = arith.constant 0 : i32
    %c0_i32_0 = arith.constant 0 : i32
    return %arg0, %c0_i32 : i32, i32
  }
  func.func @transform_1(%arg0: i32) -> (i32, i32) {
    %c0_i32 = arith.constant 0 : i32
    %c0_i32_0 = arith.constant 0 : i32
    %c0_i32_1 = arith.constant 0 : i32
    return %c0_i32, %c0_i32_0 : i32, i32
  }
  func.func @transform_2(%arg0: i32) -> (i32, i32, i32) {
    %c0_i32 = arith.constant 0 : i32
    %c0_i32_0 = arith.constant 0 : i32
    %c0_i32_1 = arith.constant 0 : i32
    %c0_i32_2 = arith.constant 0 : i32
    return %c0_i32, %c0_i32_0, %c0_i32_1 : i32, i32, i32
  }
  func.func @transform_3(%arg0: i32) -> (i32, i32, i32) {
    %c0_i32 = arith.constant 0 : i32
    %c0_i32_0 = arith.constant 0 : i32
    %c0_i32_1 = arith.constant 0 : i32
    %c0_i32_2 = arith.constant 0 : i32
    return %c0_i32, %c0_i32_0, %c0_i32_1 : i32, i32, i32
  }
  func.func @transform_4(%arg0: i32) -> (i32, i32, i32) {
    %c0_i32 = arith.constant 0 : i32
    %c0_i32_0 = arith.constant 0 : i32
    %c0_i32_1 = arith.constant 0 : i32
    return %arg0, %c0_i32, %c0_i32_0 : i32, i32, i32
  }
}

module attributes {stable_mosaic.version = 11 : i64} {
  func.func @_gmapping_kernel(%arg0: i32, %arg1: memref<16x128xf32, #tpu.memory_space<vmem>>, %arg2: memref<128x128xbf16, #tpu.memory_space<vmem>>, %arg3: memref<7x128x128xbf16, #tpu.memory_space<vmem>>, %arg4: memref<8x1x128xf32, #tpu.memory_space<vmem>>, %arg5: memref<16x4x128xf32, #tpu.memory_space<vmem>>) attributes {dimension_semantics = [#tpu.dimension_semantics<parallel>], iteration_bounds = array<i64: 1>, scalar_prefetch = 0 : i64, scratch_operands = 0 : i64, tpu.core_type = #tpu.core_type<tc>, window_params = [{transform_indices = @transform_0, window_bounds = array<i64: 16, 128>}, {pipeline_mode = #tpu.pipeline_mode<synchronous>, transform_indices = @transform_1, window_bounds = array<i64: 128, 128>}, {pipeline_mode = #tpu.pipeline_mode<synchronous>, transform_indices = @transform_2, window_bounds = array<i64: 7, 128, 128>}, {pipeline_mode = #tpu.pipeline_mode<synchronous>, transform_indices = @transform_3, window_bounds = array<i64: 8, 1, 128>}, {transform_indices = @transform_4, window_bounds = array<i64: 16, 4, 128>}]} {
    %c0 = arith.constant 0 : index
    %c0_0 = arith.constant 0 : index
    %0 = vector.load %arg1[%c0, %c0_0] : memref<16x128xf32, #tpu.memory_space<vmem>>, vector<16x128xf32>
    %1 = arith.mulf %0, %0 : vector<16x128xf32>
    %cst = arith.constant dense<0.000000e+00> : vector<16xf32>
    %2 = vector.multi_reduction <add>, %1, %cst [1] : vector<16x128xf32> to vector<16xf32>
    %3 = vector.shape_cast %2 : vector<16xf32> to vector<16x1xf32>
    %cst_1 = arith.constant 3.125000e-02 : f32
    %4 = vector.broadcast %cst_1 : f32 to vector<16x1xf32>
    %5 = arith.mulf %3, %4 : vector<16x1xf32>
    %cst_2 = arith.constant 9.99999993E-9 : f32
    %6 = vector.broadcast %cst_2 : f32 to vector<16x1xf32>
    %7 = arith.addf %5, %6 : vector<16x1xf32>
    %8 = math.rsqrt %7 : vector<16x1xf32>
    %9 = vector.broadcast %8 : vector<16x1xf32> to vector<16x128xf32>
    %10 = arith.mulf %0, %9 : vector<16x128xf32>
    %11 = vector.extract_strided_slice %10 {offsets = [0, 0], sizes = [8, 128], strides = [1, 1]} : vector<16x128xf32> to vector<8x128xf32>
    %12 = arith.truncf %11 : vector<8x128xf32> to vector<8x128xbf16>
    %13 = vector.extract_strided_slice %10 {offsets = [8, 0], sizes = [8, 128], strides = [1, 1]} : vector<16x128xf32> to vector<8x128xf32>
    %14 = arith.truncf %13 : vector<8x128xf32> to vector<8x128xbf16>
    %c0_3 = arith.constant 0 : index
    %c0_4 = arith.constant 0 : index
    %15 = vector.load %arg2[%c0_3, %c0_4] : memref<128x128xbf16, #tpu.memory_space<vmem>>, vector<128x128xbf16>
    %c0_5 = arith.constant 0 : index
    %c0_6 = arith.constant 0 : index
    %c0_7 = arith.constant 0 : index
    %16 = vector.load %arg4[%c0_5, %c0_6, %c0_7] : memref<8x1x128xf32, #tpu.memory_space<vmem>>, vector<1x1x128xf32>
    %17 = vector.shape_cast %16 : vector<1x1x128xf32> to vector<1x128xf32>
    %cst_8 = arith.constant dense<0.000000e+00> : vector<8x128xf32>
    %18 = tpu.matmul %12, %15, %cst_8 {dimension_numbers = #tpu.dot_dimension_numbers<[1], [0], [0], [1], [0, 0, 1, 1], [], []>} : vector<8x128xbf16>, vector<128x128xbf16>, vector<8x128xf32> -> vector<8x128xf32>
    %19 = vector.broadcast %17 : vector<1x128xf32> to vector<8x128xf32>
    %20 = arith.addf %18, %19 : vector<8x128xf32>
    %cst_9 = arith.constant dense<0.000000e+00> : vector<8x128xf32>
    %21 = tpu.matmul %14, %15, %cst_9 {dimension_numbers = #tpu.dot_dimension_numbers<[1], [0], [0], [1], [0, 0, 1, 1], [], []>} : vector<8x128xbf16>, vector<128x128xbf16>, vector<8x128xf32> -> vector<8x128xf32>
    %22 = vector.broadcast %17 : vector<1x128xf32> to vector<8x128xf32>
    %23 = arith.addf %21, %22 : vector<8x128xf32>
    %cst_10 = arith.constant 2.000000e-01 : f32
    %24 = vector.broadcast %cst_10 : f32 to vector<8x128xf32>
    %25 = arith.mulf %24, %20 : vector<8x128xf32>
    %26 = arith.maximumf %20, %25 : vector<8x128xf32>
    %27 = arith.truncf %26 : vector<8x128xf32> to vector<8x128xbf16>
    %cst_11 = arith.constant 2.000000e-01 : f32
    %28 = vector.broadcast %cst_11 : f32 to vector<8x128xf32>
    %29 = arith.mulf %28, %23 : vector<8x128xf32>
    %30 = arith.maximumf %23, %29 : vector<8x128xf32>
    %31 = arith.truncf %30 : vector<8x128xf32> to vector<8x128xbf16>
    %c0_12 = arith.constant 0 : index
    %c0_13 = arith.constant 0 : index
    %c0_14 = arith.constant 0 : index
    %32 = vector.load %arg3[%c0_12, %c0_13, %c0_14] : memref<7x128x128xbf16, #tpu.memory_space<vmem>>, vector<1x128x128xbf16>
    %33 = vector.shape_cast %32 : vector<1x128x128xbf16> to vector<128x128xbf16>
    %c1 = arith.constant 1 : index
    %c0_15 = arith.constant 0 : index
    %c0_16 = arith.constant 0 : index
    %34 = vector.load %arg4[%c1, %c0_15, %c0_16] : memref<8x1x128xf32, #tpu.memory_space<vmem>>, vector<1x1x128xf32>
    %35 = vector.shape_cast %34 : vector<1x1x128xf32> to vector<1x128xf32>
    %cst_17 = arith.constant dense<0.000000e+00> : vector<8x128xf32>
    %36 = tpu.matmul %27, %33, %cst_17 {dimension_numbers = #tpu.dot_dimension_numbers<[1], [0], [0], [1], [0, 0, 1, 1], [], []>} : vector<8x128xbf16>, vector<128x128xbf16>, vector<8x128xf32> -> vector<8x128xf32>
    %37 = vector.broadcast %35 : vector<1x128xf32> to vector<8x128xf32>
    %38 = arith.addf %36, %37 : vector<8x128xf32>
    %cst_18 = arith.constant dense<0.000000e+00> : vector<8x128xf32>
    %39 = tpu.matmul %31, %33, %cst_18 {dimension_numbers = #tpu.dot_dimension_numbers<[1], [0], [0], [1], [0, 0, 1, 1], [], []>} : vector<8x128xbf16>, vector<128x128xbf16>, vector<8x128xf32> -> vector<8x128xf32>
    %40 = vector.broadcast %35 : vector<1x128xf32> to vector<8x128xf32>
    %41 = arith.addf %39, %40 : vector<8x128xf32>
    %cst_19 = arith.constant 2.000000e-01 : f32
    %42 = vector.broadcast %cst_19 : f32 to vector<8x128xf32>
    %43 = arith.mulf %42, %38 : vector<8x128xf32>
    %44 = arith.maximumf %38, %43 : vector<8x128xf32>
    %45 = arith.truncf %44 : vector<8x128xf32> to vector<8x128xbf16>
    %cst_20 = arith.constant 2.000000e-01 : f32
    %46 = vector.broadcast %cst_20 : f32 to vector<8x128xf32>
    %47 = arith.mulf %46, %41 : vector<8x128xf32>
    %48 = arith.maximumf %41, %47 : vector<8x128xf32>
    %49 = arith.truncf %48 : vector<8x128xf32> to vector<8x128xbf16>
    %c1_21 = arith.constant 1 : index
    %c0_22 = arith.constant 0 : index
    %c0_23 = arith.constant 0 : index
    %50 = vector.load %arg3[%c1_21, %c0_22, %c0_23] : memref<7x128x128xbf16, #tpu.memory_space<vmem>>, vector<1x128x128xbf16>
    %51 = vector.shape_cast %50 : vector<1x128x128xbf16> to vector<128x128xbf16>
    %c2 = arith.constant 2 : index
    %c0_24 = arith.constant 0 : index
    %c0_25 = arith.constant 0 : index
    %52 = vector.load %arg4[%c2, %c0_24, %c0_25] : memref<8x1x128xf32, #tpu.memory_space<vmem>>, vector<1x1x128xf32>
    %53 = vector.shape_cast %52 : vector<1x1x128xf32> to vector<1x128xf32>
    %cst_26 = arith.constant dense<0.000000e+00> : vector<8x128xf32>
    %54 = tpu.matmul %45, %51, %cst_26 {dimension_numbers = #tpu.dot_dimension_numbers<[1], [0], [0], [1], [0, 0, 1, 1], [], []>} : vector<8x128xbf16>, vector<128x128xbf16>, vector<8x128xf32> -> vector<8x128xf32>
    %55 = vector.broadcast %53 : vector<1x128xf32> to vector<8x128xf32>
    %56 = arith.addf %54, %55 : vector<8x128xf32>
    %cst_27 = arith.constant dense<0.000000e+00> : vector<8x128xf32>
    %57 = tpu.matmul %49, %51, %cst_27 {dimension_numbers = #tpu.dot_dimension_numbers<[1], [0], [0], [1], [0, 0, 1, 1], [], []>} : vector<8x128xbf16>, vector<128x128xbf16>, vector<8x128xf32> -> vector<8x128xf32>
    %58 = vector.broadcast %53 : vector<1x128xf32> to vector<8x128xf32>
    %59 = arith.addf %57, %58 : vector<8x128xf32>
    %cst_28 = arith.constant 2.000000e-01 : f32
    %60 = vector.broadcast %cst_28 : f32 to vector<8x128xf32>
    %61 = arith.mulf %60, %56 : vector<8x128xf32>
    %62 = arith.maximumf %56, %61 : vector<8x128xf32>
    %63 = arith.truncf %62 : vector<8x128xf32> to vector<8x128xbf16>
    %cst_29 = arith.constant 2.000000e-01 : f32
    %64 = vector.broadcast %cst_29 : f32 to vector<8x128xf32>
    %65 = arith.mulf %64, %59 : vector<8x128xf32>
    %66 = arith.maximumf %59, %65 : vector<8x128xf32>
    %67 = arith.truncf %66 : vector<8x128xf32> to vector<8x128xbf16>
    %c2_30 = arith.constant 2 : index
    %c0_31 = arith.constant 0 : index
    %c0_32 = arith.constant 0 : index
    %68 = vector.load %arg3[%c2_30, %c0_31, %c0_32] : memref<7x128x128xbf16, #tpu.memory_space<vmem>>, vector<1x128x128xbf16>
    %69 = vector.shape_cast %68 : vector<1x128x128xbf16> to vector<128x128xbf16>
    %c3 = arith.constant 3 : index
    %c0_33 = arith.constant 0 : index
    %c0_34 = arith.constant 0 : index
    %70 = vector.load %arg4[%c3, %c0_33, %c0_34] : memref<8x1x128xf32, #tpu.memory_space<vmem>>, vector<1x1x128xf32>
    %71 = vector.shape_cast %70 : vector<1x1x128xf32> to vector<1x128xf32>
    %cst_35 = arith.constant dense<0.000000e+00> : vector<8x128xf32>
    %72 = tpu.matmul %63, %69, %cst_35 {dimension_numbers = #tpu.dot_dimension_numbers<[1], [0], [0], [1], [0, 0, 1, 1], [], []>} : vector<8x128xbf16>, vector<128x128xbf16>, vector<8x128xf32> -> vector<8x128xf32>
    %73 = vector.broadcast %71 : vector<1x128xf32> to vector<8x128xf32>
    %74 = arith.addf %72, %73 : vector<8x128xf32>
    %cst_36 = arith.constant dense<0.000000e+00> : vector<8x128xf32>
    %75 = tpu.matmul %67, %69, %cst_36 {dimension_numbers = #tpu.dot_dimension_numbers<[1], [0], [0], [1], [0, 0, 1, 1], [], []>} : vector<8x128xbf16>, vector<128x128xbf16>, vector<8x128xf32> -> vector<8x128xf32>
    %76 = vector.broadcast %71 : vector<1x128xf32> to vector<8x128xf32>
    %77 = arith.addf %75, %76 : vector<8x128xf32>
    %cst_37 = arith.constant 2.000000e-01 : f32
    %78 = vector.broadcast %cst_37 : f32 to vector<8x128xf32>
    %79 = arith.mulf %78, %74 : vector<8x128xf32>
    %80 = arith.maximumf %74, %79 : vector<8x128xf32>
    %81 = arith.truncf %80 : vector<8x128xf32> to vector<8x128xbf16>
    %cst_38 = arith.constant 2.000000e-01 : f32
    %82 = vector.broadcast %cst_38 : f32 to vector<8x128xf32>
    %83 = arith.mulf %82, %77 : vector<8x128xf32>
    %84 = arith.maximumf %77, %83 : vector<8x128xf32>
    %85 = arith.truncf %84 : vector<8x128xf32> to vector<8x128xbf16>
    %c3_39 = arith.constant 3 : index
    %c0_40 = arith.constant 0 : index
    %c0_41 = arith.constant 0 : index
    %86 = vector.load %arg3[%c3_39, %c0_40, %c0_41] : memref<7x128x128xbf16, #tpu.memory_space<vmem>>, vector<1x128x128xbf16>
    %87 = vector.shape_cast %86 : vector<1x128x128xbf16> to vector<128x128xbf16>
    %c4 = arith.constant 4 : index
    %c0_42 = arith.constant 0 : index
    %c0_43 = arith.constant 0 : index
    %88 = vector.load %arg4[%c4, %c0_42, %c0_43] : memref<8x1x128xf32, #tpu.memory_space<vmem>>, vector<1x1x128xf32>
    %89 = vector.shape_cast %88 : vector<1x1x128xf32> to vector<1x128xf32>
    %cst_44 = arith.constant dense<0.000000e+00> : vector<8x128xf32>
    %90 = tpu.matmul %81, %87, %cst_44 {dimension_numbers = #tpu.dot_dimension_numbers<[1], [0], [0], [1], [0, 0, 1, 1], [], []>} : vector<8x128xbf16>, vector<128x128xbf16>, vector<8x128xf32> -> vector<8x128xf32>
    %91 = vector.broadcast %89 : vector<1x128xf32> to vector<8x128xf32>
    %92 = arith.addf %90, %91 : vector<8x128xf32>
    %cst_45 = arith.constant dense<0.000000e+00> : vector<8x128xf32>
    %93 = tpu.matmul %85, %87, %cst_45 {dimension_numbers = #tpu.dot_dimension_numbers<[1], [0], [0], [1], [0, 0, 1, 1], [], []>} : vector<8x128xbf16>, vector<128x128xbf16>, vector<8x128xf32> -> vector<8x128xf32>
    %94 = vector.broadcast %89 : vector<1x128xf32> to vector<8x128xf32>
    %95 = arith.addf %93, %94 : vector<8x128xf32>
    %cst_46 = arith.constant 2.000000e-01 : f32
    %96 = vector.broadcast %cst_46 : f32 to vector<8x128xf32>
    %97 = arith.mulf %96, %92 : vector<8x128xf32>
    %98 = arith.maximumf %92, %97 : vector<8x128xf32>
    %99 = arith.truncf %98 : vector<8x128xf32> to vector<8x128xbf16>
    %cst_47 = arith.constant 2.000000e-01 : f32
    %100 = vector.broadcast %cst_47 : f32 to vector<8x128xf32>
    %101 = arith.mulf %100, %95 : vector<8x128xf32>
    %102 = arith.maximumf %95, %101 : vector<8x128xf32>
    %103 = arith.truncf %102 : vector<8x128xf32> to vector<8x128xbf16>
    %c4_48 = arith.constant 4 : index
    %c0_49 = arith.constant 0 : index
    %c0_50 = arith.constant 0 : index
    %104 = vector.load %arg3[%c4_48, %c0_49, %c0_50] : memref<7x128x128xbf16, #tpu.memory_space<vmem>>, vector<1x128x128xbf16>
    %105 = vector.shape_cast %104 : vector<1x128x128xbf16> to vector<128x128xbf16>
    %c5 = arith.constant 5 : index
    %c0_51 = arith.constant 0 : index
    %c0_52 = arith.constant 0 : index
    %106 = vector.load %arg4[%c5, %c0_51, %c0_52] : memref<8x1x128xf32, #tpu.memory_space<vmem>>, vector<1x1x128xf32>
    %107 = vector.shape_cast %106 : vector<1x1x128xf32> to vector<1x128xf32>
    %cst_53 = arith.constant dense<0.000000e+00> : vector<8x128xf32>
    %108 = tpu.matmul %99, %105, %cst_53 {dimension_numbers = #tpu.dot_dimension_numbers<[1], [0], [0], [1], [0, 0, 1, 1], [], []>} : vector<8x128xbf16>, vector<128x128xbf16>, vector<8x128xf32> -> vector<8x128xf32>
    %109 = vector.broadcast %107 : vector<1x128xf32> to vector<8x128xf32>
    %110 = arith.addf %108, %109 : vector<8x128xf32>
    %cst_54 = arith.constant dense<0.000000e+00> : vector<8x128xf32>
    %111 = tpu.matmul %103, %105, %cst_54 {dimension_numbers = #tpu.dot_dimension_numbers<[1], [0], [0], [1], [0, 0, 1, 1], [], []>} : vector<8x128xbf16>, vector<128x128xbf16>, vector<8x128xf32> -> vector<8x128xf32>
    %112 = vector.broadcast %107 : vector<1x128xf32> to vector<8x128xf32>
    %113 = arith.addf %111, %112 : vector<8x128xf32>
    %cst_55 = arith.constant 2.000000e-01 : f32
    %114 = vector.broadcast %cst_55 : f32 to vector<8x128xf32>
    %115 = arith.mulf %114, %110 : vector<8x128xf32>
    %116 = arith.maximumf %110, %115 : vector<8x128xf32>
    %117 = arith.truncf %116 : vector<8x128xf32> to vector<8x128xbf16>
    %cst_56 = arith.constant 2.000000e-01 : f32
    %118 = vector.broadcast %cst_56 : f32 to vector<8x128xf32>
    %119 = arith.mulf %118, %113 : vector<8x128xf32>
    %120 = arith.maximumf %113, %119 : vector<8x128xf32>
    %121 = arith.truncf %120 : vector<8x128xf32> to vector<8x128xbf16>
    %c5_57 = arith.constant 5 : index
    %c0_58 = arith.constant 0 : index
    %c0_59 = arith.constant 0 : index
    %122 = vector.load %arg3[%c5_57, %c0_58, %c0_59] : memref<7x128x128xbf16, #tpu.memory_space<vmem>>, vector<1x128x128xbf16>
    %123 = vector.shape_cast %122 : vector<1x128x128xbf16> to vector<128x128xbf16>
    %c6 = arith.constant 6 : index
    %c0_60 = arith.constant 0 : index
    %c0_61 = arith.constant 0 : index
    %124 = vector.load %arg4[%c6, %c0_60, %c0_61] : memref<8x1x128xf32, #tpu.memory_space<vmem>>, vector<1x1x128xf32>
    %125 = vector.shape_cast %124 : vector<1x1x128xf32> to vector<1x128xf32>
    %cst_62 = arith.constant dense<0.000000e+00> : vector<8x128xf32>
    %126 = tpu.matmul %117, %123, %cst_62 {dimension_numbers = #tpu.dot_dimension_numbers<[1], [0], [0], [1], [0, 0, 1, 1], [], []>} : vector<8x128xbf16>, vector<128x128xbf16>, vector<8x128xf32> -> vector<8x128xf32>
    %127 = vector.broadcast %125 : vector<1x128xf32> to vector<8x128xf32>
    %128 = arith.addf %126, %127 : vector<8x128xf32>
    %cst_63 = arith.constant dense<0.000000e+00> : vector<8x128xf32>
    %129 = tpu.matmul %121, %123, %cst_63 {dimension_numbers = #tpu.dot_dimension_numbers<[1], [0], [0], [1], [0, 0, 1, 1], [], []>} : vector<8x128xbf16>, vector<128x128xbf16>, vector<8x128xf32> -> vector<8x128xf32>
    %130 = vector.broadcast %125 : vector<1x128xf32> to vector<8x128xf32>
    %131 = arith.addf %129, %130 : vector<8x128xf32>
    %cst_64 = arith.constant 2.000000e-01 : f32
    %132 = vector.broadcast %cst_64 : f32 to vector<8x128xf32>
    %133 = arith.mulf %132, %128 : vector<8x128xf32>
    %134 = arith.maximumf %128, %133 : vector<8x128xf32>
    %135 = arith.truncf %134 : vector<8x128xf32> to vector<8x128xbf16>
    %cst_65 = arith.constant 2.000000e-01 : f32
    %136 = vector.broadcast %cst_65 : f32 to vector<8x128xf32>
    %137 = arith.mulf %136, %131 : vector<8x128xf32>
    %138 = arith.maximumf %131, %137 : vector<8x128xf32>
    %139 = arith.truncf %138 : vector<8x128xf32> to vector<8x128xbf16>
    %c6_66 = arith.constant 6 : index
    %c0_67 = arith.constant 0 : index
    %c0_68 = arith.constant 0 : index
    %140 = vector.load %arg3[%c6_66, %c0_67, %c0_68] : memref<7x128x128xbf16, #tpu.memory_space<vmem>>, vector<1x128x128xbf16>
    %141 = vector.shape_cast %140 : vector<1x128x128xbf16> to vector<128x128xbf16>
    %c7 = arith.constant 7 : index
    %c0_69 = arith.constant 0 : index
    %c0_70 = arith.constant 0 : index
    %142 = vector.load %arg4[%c7, %c0_69, %c0_70] : memref<8x1x128xf32, #tpu.memory_space<vmem>>, vector<1x1x128xf32>
    %143 = vector.shape_cast %142 : vector<1x1x128xf32> to vector<1x128xf32>
    %cst_71 = arith.constant dense<0.000000e+00> : vector<8x128xf32>
    %144 = tpu.matmul %135, %141, %cst_71 {dimension_numbers = #tpu.dot_dimension_numbers<[1], [0], [0], [1], [0, 0, 1, 1], [], []>} : vector<8x128xbf16>, vector<128x128xbf16>, vector<8x128xf32> -> vector<8x128xf32>
    %145 = vector.broadcast %143 : vector<1x128xf32> to vector<8x128xf32>
    %146 = arith.addf %144, %145 : vector<8x128xf32>
    %cst_72 = arith.constant dense<0.000000e+00> : vector<8x128xf32>
    %147 = tpu.matmul %139, %141, %cst_72 {dimension_numbers = #tpu.dot_dimension_numbers<[1], [0], [0], [1], [0, 0, 1, 1], [], []>} : vector<8x128xbf16>, vector<128x128xbf16>, vector<8x128xf32> -> vector<8x128xf32>
    %148 = vector.broadcast %143 : vector<1x128xf32> to vector<8x128xf32>
    %149 = arith.addf %147, %148 : vector<8x128xf32>
    %150 = vector.shape_cast %146 : vector<8x128xf32> to vector<8x1x128xf32>
    %151 = vector.shape_cast %150 : vector<8x1x128xf32> to vector<8x1x128xf32>
    %152 = vector.broadcast %151 : vector<8x1x128xf32> to vector<8x4x128xf32>
    %c0_73 = arith.constant 0 : index
    %c0_74 = arith.constant 0 : index
    %c0_75 = arith.constant 0 : index
    %153 = vector.load %arg5[%c0_73, %c0_74, %c0_75] : memref<16x4x128xf32, #tpu.memory_space<vmem>>, vector<8x4x128xf32>
    tpu.vector_store %arg5[%c0_73, %c0_74, %c0_75], %152 {strides = array<i32>} : memref<16x4x128xf32, #tpu.memory_space<vmem>>, vector<8x4x128xf32>,
    %154 = vector.shape_cast %149 : vector<8x128xf32> to vector<8x1x128xf32>
    %155 = vector.shape_cast %154 : vector<8x1x128xf32> to vector<8x1x128xf32>
    %156 = vector.broadcast %155 : vector<8x1x128xf32> to vector<8x4x128xf32>
    %c8 = arith.constant 8 : index
    %c0_76 = arith.constant 0 : index
    %c0_77 = arith.constant 0 : index
    %157 = vector.load %arg5[%c8, %c0_76, %c0_77] : memref<16x4x128xf32, #tpu.memory_space<vmem>>, vector<8x4x128xf32>
    tpu.vector_store %arg5[%c8, %c0_76, %c0_77], %156 {strides = array<i32>} : memref<16x4x128xf32, #tpu.memory_space<vmem>>, vector<8x4x128xf32>,
    return
  }
  func.func @transform_0(%arg0: i32) -> (i32, i32) {
    %c0_i32 = arith.constant 0 : i32
    %c0_i32_0 = arith.constant 0 : i32
    return %arg0, %c0_i32 : i32, i32
  }
  func.func @transform_1(%arg0: i32) -> (i32, i32) {
    %c0_i32 = arith.constant 0 : i32
    %c0_i32_0 = arith.constant 0 : i32
    %c0_i32_1 = arith.constant 0 : i32
    return %c0_i32, %c0_i32_0 : i32, i32
  }
  func.func @transform_2(%arg0: i32) -> (i32, i32, i32) {
    %c0_i32 = arith.constant 0 : i32
    %c0_i32_0 = arith.constant 0 : i32
    %c0_i32_1 = arith.constant 0 : i32
    %c0_i32_2 = arith.constant 0 : i32
    return %c0_i32, %c0_i32_0, %c0_i32_1 : i32, i32, i32
  }
  func.func @transform_3(%arg0: i32) -> (i32, i32, i32) {
    %c0_i32 = arith.constant 0 : i32
    %c0_i32_0 = arith.constant 0 : i32
    %c0_i32_1 = arith.constant 0 : i32
    %c0_i32_2 = arith.constant 0 : i32
    return %c0_i32, %c0_i32_0, %c0_i32_1 : i32, i32, i32
  }
  func.func @transform_4(%arg0: i32) -> (i32, i32, i32) {
    %c0_i32 = arith.constant 0 : i32
    %c0_i32_0 = arith.constant 0 : i32
    %c0_i32_1 = arith.constant 0 : i32
    return %arg0, %c0_i32, %c0_i32_0 : i32, i32, i32
  }
}

</mosaic_0001>

<bundles_post_ra>
// kernel: tpu_custom_call.1
= control target key start
LH: loop header
LB: loop body
LE: loop exit
PB: predicated region body
PF: predicated region fallthrough
CT: control target
= control target key end

     0   :  { %9 = vsyncpa [#allocation3], 0  ;;  %s2549_s0 = inlined_call_operand.hbm [shape: f32[16,128], index: 0, kind: input, shape index: {}]   ;;  %s2550_s1 = inlined_call_operand.hbm [shape: bf16[128,128], index: 1, kind: input, shape index: {}]   ;;  %s2551_s2 = inlined_call_operand.hbm [shape: bf16[7,128,128], index: 2, kind: input, shape index: {}]   ;;  %s2552_s3 = inlined_call_operand.vmem [shape: f32[8,1,128], index: 3, kind: input, shape index: {}]   ;;  %s2553_s4 = inlined_call_operand.hbm [shape: f32[16,4,128], index: 4, kind: output, shape index: {}]  }
   0x1   :  { %10 = vsyncpa [#allocation6], 0 }
   0x2   :  { %11 = vsyncpa [#allocation4], 0  ;;  %s2272_s15 = smov [#allocation5]   ;;  %s2178_s19 = scalar_lea.hbm %s2550_s1, 1024 }
   0x3   :  { %s29_s16 = sshll.u32 %s2272_s15, 4  ;;  %p2179_p0 = scmp.ne.s32.totalorder %s2550_s1, %s2178_s19  ;;  %s30_s16 = int_to_ptr.vmem [resolvable:$true] %s29_s16 }
   0x4   :  { %p2182_p1 = scmp.lt.u32.totalorder %s2178_s19, %s2550_s1 }
   0x6   :  { %p2184_p2 = pnand %p2182_p1, %p2179_p0 }
   0x8   :  { %2187 = shalt.err (!%p2184_p2)
}
   0x9   :  { %s2188_s24 = scalar_lea.vmem %s30_s16, 1024  ;;  %p2193_p4 = scmp.lt.s32.totalorder %s30_s16, %s30_s16 }
   0xa   :  { %p2189_p3 = scmp.ne.s32.totalorder %s30_s16, %s2188_s24  ;;  %p2194_p5 = scmp.lt.s32.totalorder %s2188_s24, %s2188_s24 }
   0xc   :  { %p2195_p6 = por %p2194_p5, %p2193_p4 }
   0xe   :  { %p2196_p7 = pnand %p2195_p6, %p2189_p3 }
  0x10   :  { %2199 = shalt.err (!%p2196_p7)
}
  0x11   :  { %s2273_s25 = smov 64   ;;  %s2274_s26 = smov 4  }
  0x12   :  { %35 = dma.hbm_to_vmem [thread:$0]  %s2550_s1, 1024, %s30_s16, [#allocation6], %s2273_s25, %s2273_s25, %s2274_s26  }
  0x13   :  { %s2275_s29 = smov [#allocation2]   ;;  %s2200_s7 = scalar_lea.hbm %s2549_s0, 256 }
  0x14   :  { %s17_s30 = sshll.u32 %s2275_s29, 4  ;;  %p2201_p8 = scmp.ne.s32.totalorder %s2549_s0, %s2200_s7  ;;  %s18_s30 = int_to_ptr.vmem [resolvable:$true] %s17_s30 }
  0x15   :  { %p2204_p9 = scmp.lt.u32.totalorder %s2200_s7, %s2549_s0 }
  0x17   :  { %p2206_p10 = pnand %p2204_p9, %p2201_p8 }
  0x19   :  { %2209 = shalt.err (!%p2206_p10)
}
  0x1a   :  { %s2210_s12 = scalar_lea.vmem %s18_s30, 256  ;;  %p2215_p12 = scmp.lt.s32.totalorder %s18_s30, %s18_s30 }
  0x1b   :  { %p2211_p11 = scmp.ne.s32.totalorder %s18_s30, %s2210_s12  ;;  %p2216_p13 = scmp.lt.s32.totalorder %s2210_s12, %s2210_s12 }
  0x1d   :  { %p2217_p0 = por %p2216_p13, %p2215_p12 }
  0x1f   :  { %p2218_p1 = pnand %p2217_p0, %p2211_p11 }
  0x21   :  { %2221 = shalt.err (!%p2218_p1)
}
  0x22   :  { %s2276_s1 = smov 128   ;;  %s2277_s13 = smov 8  }
  0x23   :  { %23 = dma.hbm_to_vmem [thread:$0]  %s2549_s0, 256, %s18_s30, [#allocation3], %s2276_s1, %s2276_s1, %s2277_s13  }
  0x24   :  { %s2278_s16 = smov [#allocation7]   ;;  %s2222_s20 = scalar_lea.hbm %s2551_s2, 7168 }
  0x25   :  { %s41_s17 = sshll.u32 %s2278_s16, 4  ;;  %p2223_p2 = scmp.ne.s32.totalorder %s2551_s2, %s2222_s20  ;;  %s42_s17 = int_to_ptr.vmem [resolvable:$true] %s41_s17 }
  0x26   :  { %p2226_p3 = scmp.lt.u32.totalorder %s2222_s20, %s2551_s2 }
  0x28   :  { %p2228_p4 = pnand %p2226_p3, %p2223_p2 }
  0x2a   :  { %2231 = shalt.err (!%p2228_p4)
}
  0x2b   :  { %s2232_s27 = scalar_lea.vmem %s42_s17, 7168  ;;  %p2237_p6 = scmp.lt.s32.totalorder %s42_s17, %s42_s17 }
  0x2c   :  { %p2233_p5 = scmp.ne.s32.totalorder %s42_s17, %s2232_s27  ;;  %p2238_p7 = scmp.lt.s32.totalorder %s2232_s27, %s2232_s27 }
  0x2e   :  { %p2239_p8 = por %p2238_p7, %p2237_p6 }
  0x30   :  { %p2240_p9 = pnand %p2239_p8, %p2233_p5 }
  0x32   :  { %2243 = shalt.err (!%p2240_p9)
}
  0x33   :  { %47 = dma.hbm_to_vmem [thread:$0]  %s2551_s2, 7168, %s42_s17, [#allocation6], %s2273_s25, %s2273_s25, %s2274_s26  }
  0x34   :  { %2266 = dma.done.wait [#allocation3], 256  }
  0x35   :  { %2267 = vsyncadd [#allocation3], 4294967040 }
  0x36   :  { %2268 = dma.done.wait [#allocation6], 8192  }
  0x37   :  { %2269 = vsyncadd [#allocation6], 4294959104  ;;  %v2279_v0 = vmov 0.0   ;;  %v60_v1 = vld [vmem:[#allocation2] sm:$0xff]  ;;  %v61_v2 = vld [vmem:[#allocation2 + $0x8] sm:$0xff]  ;;  %vm2280_vm0 = vmmov 0  }
  0x38   :  { %1779 = vmatprep.subr.bf16.mxu0 %v2279_v0  ;;  %1799 = vmatprep.subr.bf16.mxu1 %v2279_v0  ;;  %v62_v3 = vmul.f32 %v60_v1, %v60_v1  ;;  %v2110_v4 = vld [vmem:[#allocation5] sm:$0xff]   ;;  %v63_v5 = vmul.f32 %v61_v2, %v61_v2  ;;  %v2111_v6 = vld [vmem:[#allocation5 + $0x8] sm:$0xff]   ;;  %v2112_v7 = vld [vmem:[#allocation5 + $0x10] sm:$0xff]  }
  0x39   :  { %1780 = vmatpush3.bf16.msra.mxu0 %v2110_v4  ;;  %1800 = vmatpush3.bf16.msra.mxu1 %v2110_v4  ;;  %v2113_v8 = vld [vmem:[#allocation5 + $0x18] sm:$0xff]   ;;  %v2114_v9 = vld [vmem:[#allocation5 + $0x20] sm:$0xff]   ;;  %v2115_v10 = vld [vmem:[#allocation5 + $0x28] sm:$0xff]  }
  0x3a   :  { %64 = vadd.xlane.f32.xlu0 %v62_v3  ;;  %1781 = vmatprep.subr.bf16.mxu0 %v2279_v0  ;;  %v2116_v11 = vld [vmem:[#allocation5 + $0x30] sm:$0xff]   ;;  %v2117_v12 = vld [vmem:[#allocation5 + $0x38] sm:$0xff]   ;;  %v2118_v21 = vld [vmem:[#allocation7] sm:$0xff]  }
  0x3b   :  { %1801 = vmatprep.subr.bf16.mxu1 %v2279_v0  ;;  %1795 = vmatprep.mubr.msk.bf16.mxu0 %vm2280_vm0, %v2279_v0  ;;  %v2119_v25 = vld [vmem:[#allocation7 + $0x8] sm:$0xff]   ;;  %v2120_v27 = vld [vmem:[#allocation7 + $0x10] sm:$0xff]   ;;  %v2121_v28 = vld [vmem:[#allocation7 + $0x18] sm:$0xff]  }
  0x3c   :  { %1815 = vmatprep.mubr.msk.bf16.mxu1 %vm2280_vm0, %v2279_v0  ;;  %v2122_v29 = vld [vmem:[#allocation7 + $0x20] sm:$0xff]   ;;  %v2123_v30 = vld [vmem:[#allocation7 + $0x28] sm:$0xff]   ;;  %v2124_v31 = vld [vmem:[#allocation7 + $0x30] sm:$0xff]  }
  0x3d   :  { %1782 = vmatpush3.bf16.msra.mxu0 %v2111_v6  ;;  %1802 = vmatpush3.bf16.msra.mxu1 %v2111_v6  ;;  %v2125_v32 = vld [vmem:[#allocation7 + $0x38] sm:$0xff]   ;;  %v1556_v33 = vld [vmem:[%s2552_s3] ss:$0 sm:$0xff]  ;;  %v2126_v45 = vld [vmem:[#allocation7 + $0x40] sm:$0xff]  }
  0x3e   :  { %66 = vadd.xlane.f32.xlu0 %v63_v5  ;;  %1783 = vmatprep.subr.bf16.mxu0 %v2279_v0  ;;  %v2127_v50 = vld [vmem:[#allocation7 + $0x48] sm:$0xff]   ;;  %v2128_v52 = vld [vmem:[#allocation7 + $0x50] sm:$0xff]   ;;  %v2129_v53 = vld [vmem:[#allocation7 + $0x58] sm:$0xff]  }
  0x3f   :  { %1803 = vmatprep.subr.bf16.mxu1 %v2279_v0  ;;  %v2130_v54 = vld [vmem:[#allocation7 + $0x60] sm:$0xff]   ;;  %v2131_v55 = vld [vmem:[#allocation7 + $0x68] sm:$0xff]   ;;  %v2132_v56 = vld [vmem:[#allocation7 + $0x70] sm:$0xff]  }
  0x40   :  { %v2133_v57 = vld [vmem:[#allocation7 + $0x78] sm:$0xff]   ;;  %v1566_v58 = vld [vmem:[%s2552_s3 + $0x1] ss:$0 sm:$0xff] }
  0x41   :  { %1784 = vmatpush3.bf16.msra.mxu0 %v2112_v7  ;;  %1804 = vmatpush3.bf16.msra.mxu1 %v2112_v7  ;;  %v2134_v7 = vld [vmem:[#allocation7 + $0x80] sm:$0xff]  }
  0x42   :  { %1785 = vmatprep.subr.bf16.mxu0 %v2279_v0  ;;  %1805 = vmatprep.subr.bf16.mxu1 %v2279_v0 }
  0x45   :  { %1786 = vmatpush3.bf16.msra.mxu0 %v2113_v8  ;;  %1806 = vmatpush3.bf16.msra.mxu1 %v2113_v8 }
  0x46   :  { %1787 = vmatprep.subr.bf16.mxu0 %v2279_v0  ;;  %1807 = vmatprep.subr.bf16.mxu1 %v2279_v0 }
  0x49   :  { %1788 = vmatpush3.bf16.msra.mxu0 %v2114_v9  ;;  %1808 = vmatpush3.bf16.msra.mxu1 %v2114_v9 }
  0x4a   :  { %1789 = vmatprep.subr.bf16.mxu0 %v2279_v0  ;;  %1809 = vmatprep.subr.bf16.mxu1 %v2279_v0 }
  0x4d   :  { %1790 = vmatpush3.bf16.msra.mxu0 %v2115_v10  ;;  %1810 = vmatpush3.bf16.msra.mxu1 %v2115_v10 }
  0x4e   :  { %1791 = vmatprep.subr.bf16.mxu0 %v2279_v0  ;;  %1811 = vmatprep.subr.bf16.mxu1 %v2279_v0 }
  0x51   :  { %1792 = vmatpush3.bf16.msra.mxu0 %v2116_v11  ;;  %1812 = vmatpush3.bf16.msra.mxu1 %v2116_v11 }
  0x52   :  { %1793 = vmatprep.subr.bf16.mxu0 %v2279_v0  ;;  %1813 = vmatprep.subr.bf16.mxu1 %v2279_v0 }
  0x55   :  { %1794 = vmatpush3.bf16.msra.mxu0 %v2117_v12  ;;  %1814 = vmatpush3.bf16.msra.mxu1 %v2117_v12  ;;  %v2135_v12 = vld [vmem:[#allocation7 + $0x88] sm:$0xff]  }
  0x56   :  { %1819 = vmatprep.subr.bf16.mxu0 %v2279_v0  ;;  %1839 = vmatprep.subr.bf16.mxu1 %v2279_v0 }
  0xc7   :  { %v65_v13 = vpop.xlane.xlu0 %64 }
  0xc8   :  { %v68_v14 = vmul.f32 0.03125, %v65_v13 }
  0xca   :  { %v70_v15 = vadd.f32 1e-08, %v68_v14  ;;  %v2136_v14 = vld [vmem:[#allocation7 + $0x90] sm:$0xff]  }
  0xcb   :  { %v67_v16 = vpop.xlane.xlu0 %66 }
  0xcc   :  { %2174 = vrsqrt.f32 %v70_v15  ;;  %v69_v17 = vmul.f32 0.03125, %v67_v16  ;;  %v2137_v15 = vld [vmem:[#allocation7 + $0x98] sm:$0xff]   ;;  %v2138_v16 = vld [vmem:[#allocation7 + $0xa0] sm:$0xff]  }
  0xce   :  { %v71_v18 = vadd.f32 1e-08, %v69_v17  ;;  %v2139_v17 = vld [vmem:[#allocation7 + $0xa8] sm:$0xff]  }
  0xd0   :  { %2176 = vrsqrt.f32 %v71_v18  ;;  %v2140_v18 = vld [vmem:[#allocation7 + $0xb0] sm:$0xff]  }
  0xd6   :  { %v2175_v19 = vpop.eup %2174 }
  0xd7   :  { %v74_v20 = vmul.f32 %v2175_v19, %v60_v1  ;;  %v2141_v19 = vld [vmem:[#allocation7 + $0xb8] sm:$0xff]  }
  0xd9   :  { %v76_v22 = vpack.c.bf16 %v74_v20, %v74_v20  ;;  %v1576_v20 = vld [vmem:[%s2552_s3 + $0x2] ss:$0 sm:$0xff] }
  0xda   :  { %v2177_v23 = vpop.eup %2176 }
  0xdb   :  { %1796 = vmatmul.mubr.bf16.vlgmr.msra.gmra.mrb[0].mxu0 %v76_v22  ;;  %v75_v24 = vmul.f32 %v2177_v23, %v61_v2 }
  0xdc   :  { %1820 = vmatpush3.bf16.msra.mxu0 %v2118_v21  ;;  %1835 = vmatprep.mubr.msk.bf16.mxu0 %vm2280_vm0, %v2279_v0 }
  0xdd   :  { %v77_v26 = vpack.c.bf16 %v75_v24, %v75_v24  ;;  %1821 = vmatprep.subr.bf16.mxu0 %v2279_v0 }
  0xdf   :  { %1816 = vmatmul.mubr.bf16.vlgmr.msra.gmra.mrb[0].mxu1 %v77_v26 }
  0xe0   :  { %1822 = vmatpush3.bf16.msra.mxu0 %v2119_v25  ;;  %1840 = vmatpush3.bf16.msra.mxu1 %v2118_v21 }
  0xe1   :  { %1823 = vmatprep.subr.bf16.mxu0 %v2279_v0  ;;  %1841 = vmatprep.subr.bf16.mxu1 %v2279_v0 }
  0xe2   :  { %1855 = vmatprep.mubr.msk.bf16.mxu1 %vm2280_vm0, %v2279_v0 }
  0xe4   :  { %1824 = vmatpush3.bf16.msra.mxu0 %v2120_v27  ;;  %1842 = vmatpush3.bf16.msra.mxu1 %v2119_v25 }
  0xe5   :  { %1825 = vmatprep.subr.bf16.mxu0 %v2279_v0  ;;  %1843 = vmatprep.subr.bf16.mxu1 %v2279_v0 }
  0xe8   :  { %1826 = vmatpush3.bf16.msra.mxu0 %v2121_v28  ;;  %1844 = vmatpush3.bf16.msra.mxu1 %v2120_v27 }
  0xe9   :  { %1827 = vmatprep.subr.bf16.mxu0 %v2279_v0  ;;  %1845 = vmatprep.subr.bf16.mxu1 %v2279_v0 }
  0xec   :  { %1828 = vmatpush3.bf16.msra.mxu0 %v2122_v29  ;;  %1846 = vmatpush3.bf16.msra.mxu1 %v2121_v28 }
  0xed   :  { %1829 = vmatprep.subr.bf16.mxu0 %v2279_v0  ;;  %1847 = vmatprep.subr.bf16.mxu1 %v2279_v0 }
  0xf0   :  { %1830 = vmatpush3.bf16.msra.mxu0 %v2123_v30  ;;  %1848 = vmatpush3.bf16.msra.mxu1 %v2122_v29 }
  0xf1   :  { %1831 = vmatprep.subr.bf16.mxu0 %v2279_v0  ;;  %1849 = vmatprep.subr.bf16.mxu1 %v2279_v0 }
  0xf4   :  { %1850 = vmatpush3.bf16.msra.mxu1 %v2123_v30  ;;  %1832 = vmatpush3.bf16.msra.mxu0 %v2124_v31 }
  0xf5   :  { %1851 = vmatprep.subr.bf16.mxu1 %v2279_v0  ;;  %1833 = vmatprep.subr.bf16.mxu0 %v2279_v0 }
  0xf8   :  { %1852 = vmatpush3.bf16.msra.mxu1 %v2124_v31  ;;  %1834 = vmatpush3.bf16.msra.mxu0 %v2125_v32 }
  0xf9   :  { %1853 = vmatprep.subr.bf16.mxu1 %v2279_v0  ;;  %1859 = vmatprep.subr.bf16.mxu0 %v2279_v0 }
  0xfc   :  { %1854 = vmatpush3.bf16.msra.mxu1 %v2125_v32  ;;  %v2142_v32 = vld [vmem:[#allocation7 + $0xc0] sm:$0xff]  }
  0xfd   :  { %1879 = vmatprep.subr.bf16.mxu1 %v2279_v0 }
 0x1ae   :  { %v183_v34 = vpop.f32.mrb[0].mxu0 }
 0x1af   :  { %v184_v35 = vadd.f32 %v1556_v33, %v183_v34  ;;  %v1797_v36 = vpop.f32.mrb[1].mxu0 }
 0x1b0   :  { %v186_v37 = vpop.f32.mrb[2].mxu0 }
 0x1b1   :  { %v229_v38 = vmul.f32 0.2, %v184_v35  ;;  %v1798_v39 = vpop.f32.mrb[3].mxu0  ;;  %v2143_v37 = vld [vmem:[#allocation7 + $0xc8] sm:$0xff]  }
 0x1b2   :  { %v223_v40 = vpop.f32.mrb[0].mxu1  ;;  %v2144_v39 = vld [vmem:[#allocation7 + $0xd0] sm:$0xff]  }
 0x1b3   :  { %v230_v41 = vmax.f32 %v184_v35, %v229_v38  ;;  %v224_v42 = vadd.f32 %v1556_v33, %v223_v40  ;;  %v1817_v43 = vpop.f32.mrb[1].mxu1  ;;  %v2145_v40 = vld [vmem:[#allocation7 + $0xd8] sm:$0xff]  }
 0x1b4   :  { %v226_v44 = vpop.f32.mrb[2].mxu1  ;;  %v2148_v43 = vld [vmem:[#allocation7 + $0xf0] sm:$0xff]  }
 0x1b5   :  { %v231_v46 = vpack.c.bf16 %v230_v41, %v230_v41  ;;  %v232_v47 = vmul.f32 0.2, %v224_v42  ;;  %v1818_v48 = vpop.f32.mrb[3].mxu1  ;;  %v2146_v41 = vld [vmem:[#allocation7 + $0xe0] sm:$0xff]   ;;  %v2149_v44 = vld [vmem:[#allocation7 + $0xf8] sm:$0xff]  }
 0x1b7   :  { %v233_v49 = vmax.f32 %v224_v42, %v232_v47  ;;  %1836 = vmatmul.mubr.bf16.vlgmr.msra.gmra.mrb[4].mxu0 %v231_v46  ;;  %v2147_v42 = vld [vmem:[#allocation7 + $0xe8] sm:$0xff]  }
 0x1b8   :  { %1860 = vmatpush3.bf16.msra.mxu0 %v2126_v45  ;;  %1875 = vmatprep.mubr.msk.bf16.mxu0 %vm2280_vm0, %v2279_v0 }
 0x1b9   :  { %v234_v51 = vpack.c.bf16 %v233_v49, %v233_v49  ;;  %1861 = vmatprep.subr.bf16.mxu0 %v2279_v0 }
 0x1bb   :  { %1856 = vmatmul.mubr.bf16.vlgmr.msra.gmra.mrb[4].mxu1 %v234_v51 }
 0x1bc   :  { %1862 = vmatpush3.bf16.msra.mxu0 %v2127_v50  ;;  %1880 = vmatpush3.bf16.msra.mxu1 %v2126_v45  ;;  %v1586_v45 = vld [vmem:[%s2552_s3 + $0x3] ss:$0 sm:$0xff] }
 0x1bd   :  { %1863 = vmatprep.subr.bf16.mxu0 %v2279_v0  ;;  %1881 = vmatprep.subr.bf16.mxu1 %v2279_v0 }
 0x1be   :  { %1895 = vmatprep.mubr.msk.bf16.mxu1 %vm2280_vm0, %v2279_v0 }
 0x1c0   :  { %1864 = vmatpush3.bf16.msra.mxu0 %v2128_v52  ;;  %1882 = vmatpush3.bf16.msra.mxu1 %v2127_v50 }
 0x1c1   :  { %1865 = vmatprep.subr.bf16.mxu0 %v2279_v0  ;;  %1883 = vmatprep.subr.bf16.mxu1 %v2279_v0 }
 0x1c4   :  { %1866 = vmatpush3.bf16.msra.mxu0 %v2129_v53  ;;  %1884 = vmatpush3.bf16.msra.mxu1 %v2128_v52 }
 0x1c5   :  { %1867 = vmatprep.subr.bf16.mxu0 %v2279_v0  ;;  %1885 = vmatprep.subr.bf16.mxu1 %v2279_v0 }
 0x1c8   :  { %1868 = vmatpush3.bf16.msra.mxu0 %v2130_v54  ;;  %1886 = vmatpush3.bf16.msra.mxu1 %v2129_v53 }
 0x1c9   :  { %1869 = vmatprep.subr.bf16.mxu0 %v2279_v0  ;;  %1887 = vmatprep.subr.bf16.mxu1 %v2279_v0 }
 0x1cc   :  { %1870 = vmatpush3.bf16.msra.mxu0 %v2131_v55  ;;  %1888 = vmatpush3.bf16.msra.mxu1 %v2130_v54 }
 0x1cd   :  { %1871 = vmatprep.subr.bf16.mxu0 %v2279_v0  ;;  %1889 = vmatprep.subr.bf16.mxu1 %v2279_v0 }
 0x1d0   :  { %1890 = vmatpush3.bf16.msra.mxu1 %v2131_v55  ;;  %1872 = vmatpush3.bf16.msra.mxu0 %v2132_v56 }
 0x1d1   :  { %1891 = vmatprep.subr.bf16.mxu1 %v2279_v0  ;;  %1873 = vmatprep.subr.bf16.mxu0 %v2279_v0 }
 0x1d4   :  { %1892 = vmatpush3.bf16.msra.mxu1 %v2132_v56  ;;  %1874 = vmatpush3.bf16.msra.mxu0 %v2133_v57 }
 0x1d5   :  { %1893 = vmatprep.subr.bf16.mxu1 %v2279_v0  ;;  %1899 = vmatprep.subr.bf16.mxu0 %v2279_v0 }
 0x1d8   :  { %1894 = vmatpush3.bf16.msra.mxu1 %v2133_v57  ;;  %v2150_v57 = vld [vmem:[#allocation7 + $0x100] sm:$0xff]  }
 0x1d9   :  { %1919 = vmatprep.subr.bf16.mxu1 %v2279_v0 }
 0x28a   :  { %v341_v59 = vpop.f32.mrb[4].mxu0 }
 0x28b   :  { %v342_v60 = vadd.f32 %v1566_v58, %v341_v59  ;;  %v1837_v61 = vpop.f32.mrb[5].mxu0 }
 0x28c   :  { %v344_v62 = vpop.f32.mrb[6].mxu0 }
 0x28d   :  { %v387_v63 = vmul.f32 0.2, %v342_v60  ;;  %v1838_v1 = vpop.f32.mrb[7].mxu0  ;;  %v2151_v62 = vld [vmem:[#allocation7 + $0x108] sm:$0xff]  }
 0x28e   :  { %v381_v2 = vpop.f32.mrb[4].mxu1  ;;  %v2152_v1 = vld [vmem:[#allocation7 + $0x110] sm:$0xff]  }
 0x28f   :  { %v388_v3 = vmax.f32 %v342_v60, %v387_v63  ;;  %v382_v4 = vadd.f32 %v1566_v58, %v381_v2  ;;  %v1857_v5 = vpop.f32.mrb[5].mxu1  ;;  %v2153_v2 = vld [vmem:[#allocation7 + $0x118] sm:$0xff]  }
 0x290   :  { %v384_v6 = vpop.f32.mrb[6].mxu1  ;;  %v2156_v5 = vld [vmem:[#allocation7 + $0x130] sm:$0xff]  }
 0x291   :  { %v389_v8 = vpack.c.bf16 %v388_v3, %v388_v3  ;;  %v390_v9 = vmul.f32 0.2, %v382_v4  ;;  %v1858_v10 = vpop.f32.mrb[7].mxu1  ;;  %v2154_v3 = vld [vmem:[#allocation7 + $0x120] sm:$0xff]   ;;  %v2157_v6 = vld [vmem:[#allocation7 + $0x138] sm:$0xff]  }
 0x293   :  { %v391_v11 = vmax.f32 %v382_v4, %v390_v9  ;;  %1876 = vmatmul.mubr.bf16.vlgmr.msra.gmra.mrb[8].mxu0 %v389_v8  ;;  %v2155_v4 = vld [vmem:[#allocation7 + $0x128] sm:$0xff]  }
 0x294   :  { %1900 = vmatpush3.bf16.msra.mxu0 %v2134_v7  ;;  %1915 = vmatprep.mubr.msk.bf16.mxu0 %vm2280_vm0, %v2279_v0 }
 0x295   :  { %v392_v13 = vpack.c.bf16 %v391_v11, %v391_v11  ;;  %1901 = vmatprep.subr.bf16.mxu0 %v2279_v0 }
 0x297   :  { %1896 = vmatmul.mubr.bf16.vlgmr.msra.gmra.mrb[8].mxu1 %v392_v13 }
 0x298   :  { %1902 = vmatpush3.bf16.msra.mxu0 %v2135_v12  ;;  %1920 = vmatpush3.bf16.msra.mxu1 %v2134_v7  ;;  %v1596_v7 = vld [vmem:[%s2552_s3 + $0x4] ss:$0 sm:$0xff] }
 0x299   :  { %1903 = vmatprep.subr.bf16.mxu0 %v2279_v0  ;;  %1921 = vmatprep.subr.bf16.mxu1 %v2279_v0 }
 0x29a   :  { %1935 = vmatprep.mubr.msk.bf16.mxu1 %vm2280_vm0, %v2279_v0 }
 0x29c   :  { %1904 = vmatpush3.bf16.msra.mxu0 %v2136_v14  ;;  %1922 = vmatpush3.bf16.msra.mxu1 %v2135_v12 }
 0x29d   :  { %1905 = vmatprep.subr.bf16.mxu0 %v2279_v0  ;;  %1923 = vmatprep.subr.bf16.mxu1 %v2279_v0 }
 0x2a0   :  { %1906 = vmatpush3.bf16.msra.mxu0 %v2137_v15  ;;  %1924 = vmatpush3.bf16.msra.mxu1 %v2136_v14 }
 0x2a1   :  { %1907 = vmatprep.subr.bf16.mxu0 %v2279_v0  ;;  %1925 = vmatprep.subr.bf16.mxu1 %v2279_v0 }
 0x2a4   :  { %1908 = vmatpush3.bf16.msra.mxu0 %v2138_v16  ;;  %1926 = vmatpush3.bf16.msra.mxu1 %v2137_v15 }
 0x2a5   :  { %1909 = vmatprep.subr.bf16.mxu0 %v2279_v0  ;;  %1927 = vmatprep.subr.bf16.mxu1 %v2279_v0 }
 0x2a8   :  { %1910 = vmatpush3.bf16.msra.mxu0 %v2139_v17  ;;  %1928 = vmatpush3.bf16.msra.mxu1 %v2138_v16 }
 0x2a9   :  { %1911 = vmatprep.subr.bf16.mxu0 %v2279_v0  ;;  %1929 = vmatprep.subr.bf16.mxu1 %v2279_v0 }
 0x2ac   :  { %1930 = vmatpush3.bf16.msra.mxu1 %v2139_v17  ;;  %1912 = vmatpush3.bf16.msra.mxu0 %v2140_v18 }
 0x2ad   :  { %1931 = vmatprep.subr.bf16.mxu1 %v2279_v0  ;;  %1913 = vmatprep.subr.bf16.mxu0 %v2279_v0 }
 0x2b0   :  { %1932 = vmatpush3.bf16.msra.mxu1 %v2140_v18  ;;  %1914 = vmatpush3.bf16.msra.mxu0 %v2141_v19 }
 0x2b1   :  { %1933 = vmatprep.subr.bf16.mxu1 %v2279_v0  ;;  %1939 = vmatprep.subr.bf16.mxu0 %v2279_v0 }
 0x2b4   :  { %1934 = vmatpush3.bf16.msra.mxu1 %v2141_v19  ;;  %v2158_v19 = vld [vmem:[#allocation7 + $0x140] sm:$0xff]  }
 0x2b5   :  { %1959 = vmatprep.subr.bf16.mxu1 %v2279_v0 }
 0x366   :  { %v500_v21 = vpop.f32.mrb[8].mxu0 }
 0x367   :  { %v501_v22 = vadd.f32 %v1576_v20, %v500_v21  ;;  %v1877_v23 = vpop.f32.mrb[9].mxu0 }
 0x368   :  { %v503_v24 = vpop.f32.mrb[10].mxu0 }
 0x369   :  { %v546_v25 = vmul.f32 0.2, %v501_v22  ;;  %v1878_v26 = vpop.f32.mrb[11].mxu0  ;;  %v2159_v24 = vld [vmem:[#allocation7 + $0x148] sm:$0xff]  }
 0x36a   :  { %v540_v27 = vpop.f32.mrb[8].mxu1  ;;  %v2160_v26 = vld [vmem:[#allocation7 + $0x150] sm:$0xff]  }
 0x36b   :  { %v547_v28 = vmax.f32 %v501_v22, %v546_v25  ;;  %v541_v29 = vadd.f32 %v1576_v20, %v540_v27  ;;  %v1897_v30 = vpop.f32.mrb[9].mxu1  ;;  %v2161_v27 = vld [vmem:[#allocation7 + $0x158] sm:$0xff]  }
 0x36c   :  { %v543_v31 = vpop.f32.mrb[10].mxu1  ;;  %v2164_v30 = vld [vmem:[#allocation7 + $0x170] sm:$0xff]  }
 0x36d   :  { %v548_v33 = vpack.c.bf16 %v547_v28, %v547_v28  ;;  %v549_v34 = vmul.f32 0.2, %v541_v29  ;;  %v1898_v35 = vpop.f32.mrb[11].mxu1  ;;  %v2162_v28 = vld [vmem:[#allocation7 + $0x160] sm:$0xff]   ;;  %v2165_v31 = vld [vmem:[#allocation7 + $0x178] sm:$0xff]  }
 0x36f   :  { %v550_v36 = vmax.f32 %v541_v29, %v549_v34  ;;  %1916 = vmatmul.mubr.bf16.vlgmr.msra.gmra.mrb[12].mxu0 %v548_v33  ;;  %v2163_v29 = vld [vmem:[#allocation7 + $0x168] sm:$0xff]  }
 0x370   :  { %1940 = vmatpush3.bf16.msra.mxu0 %v2142_v32  ;;  %1955 = vmatprep.mubr.msk.bf16.mxu0 %vm2280_vm0, %v2279_v0 }
 0x371   :  { %v551_v38 = vpack.c.bf16 %v550_v36, %v550_v36  ;;  %1941 = vmatprep.subr.bf16.mxu0 %v2279_v0 }
 0x373   :  { %1936 = vmatmul.mubr.bf16.vlgmr.msra.gmra.mrb[12].mxu1 %v551_v38 }
 0x374   :  { %1942 = vmatpush3.bf16.msra.mxu0 %v2143_v37  ;;  %1960 = vmatpush3.bf16.msra.mxu1 %v2142_v32  ;;  %v1606_v32 = vld [vmem:[%s2552_s3 + $0x5] ss:$0 sm:$0xff] }
 0x375   :  { %1943 = vmatprep.subr.bf16.mxu0 %v2279_v0  ;;  %1961 = vmatprep.subr.bf16.mxu1 %v2279_v0 }
 0x376   :  { %1975 = vmatprep.mubr.msk.bf16.mxu1 %vm2280_vm0, %v2279_v0 }
 0x378   :  { %1944 = vmatpush3.bf16.msra.mxu0 %v2144_v39  ;;  %1962 = vmatpush3.bf16.msra.mxu1 %v2143_v37 }
 0x379   :  { %1945 = vmatprep.subr.bf16.mxu0 %v2279_v0  ;;  %1963 = vmatprep.subr.bf16.mxu1 %v2279_v0 }
 0x37c   :  { %1946 = vmatpush3.bf16.msra.mxu0 %v2145_v40  ;;  %1964 = vmatpush3.bf16.msra.mxu1 %v2144_v39 }
 0x37d   :  { %1947 = vmatprep.subr.bf16.mxu0 %v2279_v0  ;;  %1965 = vmatprep.subr.bf16.mxu1 %v2279_v0 }
 0x380   :  { %1948 = vmatpush3.bf16.msra.mxu0 %v2146_v41  ;;  %1966 = vmatpush3.bf16.msra.mxu1 %v2145_v40 }
 0x381   :  { %1949 = vmatprep.subr.bf16.mxu0 %v2279_v0  ;;  %1967 = vmatprep.subr.bf16.mxu1 %v2279_v0 }
 0x384   :  { %1950 = vmatpush3.bf16.msra.mxu0 %v2147_v42  ;;  %1968 = vmatpush3.bf16.msra.mxu1 %v2146_v41 }
 0x385   :  { %1951 = vmatprep.subr.bf16.mxu0 %v2279_v0  ;;  %1969 = vmatprep.subr.bf16.mxu1 %v2279_v0 }
 0x388   :  { %1970 = vmatpush3.bf16.msra.mxu1 %v2147_v42  ;;  %1952 = vmatpush3.bf16.msra.mxu0 %v2148_v43 }
 0x389   :  { %1971 = vmatprep.subr.bf16.mxu1 %v2279_v0  ;;  %1953 = vmatprep.subr.bf16.mxu0 %v2279_v0 }
 0x38c   :  { %1972 = vmatpush3.bf16.msra.mxu1 %v2148_v43  ;;  %1954 = vmatpush3.bf16.msra.mxu0 %v2149_v44 }
 0x38d   :  { %1973 = vmatprep.subr.bf16.mxu1 %v2279_v0  ;;  %1979 = vmatprep.subr.bf16.mxu0 %v2279_v0 }
 0x390   :  { %1974 = vmatpush3.bf16.msra.mxu1 %v2149_v44  ;;  %v2166_v44 = vld [vmem:[#allocation7 + $0x180] sm:$0xff]  }
 0x391   :  { %1999 = vmatprep.subr.bf16.mxu1 %v2279_v0 }
 0x442   :  { %v659_v46 = vpop.f32.mrb[12].mxu0 }
 0x443   :  { %v660_v47 = vadd.f32 %v1586_v45, %v659_v46  ;;  %v1917_v48 = vpop.f32.mrb[13].mxu0 }
 0x444   :  { %v662_v49 = vpop.f32.mrb[14].mxu0 }
 0x445   :  { %v705_v50 = vmul.f32 0.2, %v660_v47  ;;  %v1918_v51 = vpop.f32.mrb[15].mxu0  ;;  %v2167_v49 = vld [vmem:[#allocation7 + $0x188] sm:$0xff]  }
 0x446   :  { %v699_v52 = vpop.f32.mrb[12].mxu1  ;;  %v2168_v51 = vld [vmem:[#allocation7 + $0x190] sm:$0xff]  }
 0x447   :  { %v706_v53 = vmax.f32 %v660_v47, %v705_v50  ;;  %v700_v54 = vadd.f32 %v1586_v45, %v699_v52  ;;  %v1937_v55 = vpop.f32.mrb[13].mxu1  ;;  %v2169_v52 = vld [vmem:[#allocation7 + $0x198] sm:$0xff]  }
 0x448   :  { %v702_v56 = vpop.f32.mrb[14].mxu1  ;;  %v2172_v55 = vld [vmem:[#allocation7 + $0x1b0] sm:$0xff]  }
 0x449   :  { %v707_v58 = vpack.c.bf16 %v706_v53, %v706_v53  ;;  %v708_v59 = vmul.f32 0.2, %v700_v54  ;;  %v1938_v60 = vpop.f32.mrb[15].mxu1  ;;  %v2170_v53 = vld [vmem:[#allocation7 + $0x1a0] sm:$0xff]   ;;  %v2173_v56 = vld [vmem:[#allocation7 + $0x1b8] sm:$0xff]  }
 0x44b   :  { %v709_v61 = vmax.f32 %v700_v54, %v708_v59  ;;  %1956 = vmatmul.mubr.bf16.vlgmr.msra.gmra.mrb[16].mxu0 %v707_v58  ;;  %v2171_v54 = vld [vmem:[#allocation7 + $0x1a8] sm:$0xff]  }
 0x44c   :  { %1980 = vmatpush3.bf16.msra.mxu0 %v2150_v57  ;;  %1995 = vmatprep.mubr.msk.bf16.mxu0 %vm2280_vm0, %v2279_v0 }
 0x44d   :  { %v710_v63 = vpack.c.bf16 %v709_v61, %v709_v61  ;;  %1981 = vmatprep.subr.bf16.mxu0 %v2279_v0 }
 0x44f   :  { %1976 = vmatmul.mubr.bf16.vlgmr.msra.gmra.mrb[16].mxu1 %v710_v63 }
 0x450   :  { %1982 = vmatpush3.bf16.msra.mxu0 %v2151_v62  ;;  %2000 = vmatpush3.bf16.msra.mxu1 %v2150_v57  ;;  %v1616_v57 = vld [vmem:[%s2552_s3 + $0x6] ss:$0 sm:$0xff] }
 0x451   :  { %1983 = vmatprep.subr.bf16.mxu0 %v2279_v0  ;;  %2001 = vmatprep.subr.bf16.mxu1 %v2279_v0 }
 0x452   :  { %2015 = vmatprep.mubr.msk.bf16.mxu1 %vm2280_vm0, %v2279_v0 }
 0x454   :  { %1984 = vmatpush3.bf16.msra.mxu0 %v2152_v1  ;;  %2002 = vmatpush3.bf16.msra.mxu1 %v2151_v62 }
 0x455   :  { %1985 = vmatprep.subr.bf16.mxu0 %v2279_v0  ;;  %2003 = vmatprep.subr.bf16.mxu1 %v2279_v0 }
 0x458   :  { %1986 = vmatpush3.bf16.msra.mxu0 %v2153_v2  ;;  %2004 = vmatpush3.bf16.msra.mxu1 %v2152_v1 }
 0x459   :  { %1987 = vmatprep.subr.bf16.mxu0 %v2279_v0  ;;  %2005 = vmatprep.subr.bf16.mxu1 %v2279_v0 }
 0x45c   :  { %1988 = vmatpush3.bf16.msra.mxu0 %v2154_v3  ;;  %2006 = vmatpush3.bf16.msra.mxu1 %v2153_v2 }
 0x45d   :  { %1989 = vmatprep.subr.bf16.mxu0 %v2279_v0  ;;  %2007 = vmatprep.subr.bf16.mxu1 %v2279_v0 }
 0x460   :  { %1990 = vmatpush3.bf16.msra.mxu0 %v2155_v4  ;;  %2008 = vmatpush3.bf16.msra.mxu1 %v2154_v3 }
 0x461   :  { %1991 = vmatprep.subr.bf16.mxu0 %v2279_v0  ;;  %2009 = vmatprep.subr.bf16.mxu1 %v2279_v0 }
 0x464   :  { %2010 = vmatpush3.bf16.msra.mxu1 %v2155_v4  ;;  %1992 = vmatpush3.bf16.msra.mxu0 %v2156_v5 }
 0x465   :  { %2011 = vmatprep.subr.bf16.mxu1 %v2279_v0  ;;  %1993 = vmatprep.subr.bf16.mxu0 %v2279_v0 }
 0x468   :  { %2012 = vmatpush3.bf16.msra.mxu1 %v2156_v5  ;;  %1994 = vmatpush3.bf16.msra.mxu0 %v2157_v6 }
 0x469   :  { %2013 = vmatprep.subr.bf16.mxu1 %v2279_v0  ;;  %2019 = vmatprep.subr.bf16.mxu0 %v2279_v0 }
 0x46c   :  { %2014 = vmatpush3.bf16.msra.mxu1 %v2157_v6 }
 0x46d   :  { %2039 = vmatprep.subr.bf16.mxu1 %v2279_v0 }
 0x51e   :  { %v818_v8 = vpop.f32.mrb[16].mxu0 }
 0x51f   :  { %v819_v9 = vadd.f32 %v1596_v7, %v818_v8  ;;  %v1957_v10 = vpop.f32.mrb[17].mxu0 }
 0x520   :  { %v821_v11 = vpop.f32.mrb[18].mxu0  ;;  %v2281_v10 = vmov 1966171168  }
 0x521   :  { %v864_v12 = vmul.f32 0.2, %v819_v9  ;;  %v1958_v13 = vpop.f32.mrb[19].mxu0  ;;  %v1344_v11 = vunpack.c.l.s4 %v2281_v10 }
 0x522   :  { %v858_v14 = vpop.f32.mrb[16].mxu1 }
 0x523   :  { %v865_v15 = vmax.f32 %v819_v9, %v864_v12  ;;  %v859_v16 = vadd.f32 %v1596_v7, %v858_v14  ;;  %v1977_v17 = vpop.f32.mrb[17].mxu1  ;;  %v1346_v12 = vlaneseq  ;;  %v1345_v13 = vunpack.c.0.s8 %v1344_v11 }
 0x524   :  { %v861_v18 = vpop.f32.mrb[18].mxu1 }
 0x525   :  { %v866_v20 = vpack.c.bf16 %v865_v15, %v865_v15  ;;  %v867_v21 = vmul.f32 0.2, %v859_v16  ;;  %v1978_v22 = vpop.f32.mrb[19].mxu1  ;;  %v1347_v14 = vshrl.u32 %v1346_v12, 7  ;;  %v1626_v15 = vld [vmem:[%s2552_s3 + $0x7] ss:$0 sm:$0xff] }
 0x526   :  { %s2282_s3 = smov [#allocation8]  }
 0x527   :  { %v868_v23 = vmax.f32 %v859_v16, %v867_v21  ;;  %1996 = vmatmul.mubr.bf16.vlgmr.msra.gmra.mrb[20].mxu0 %v866_v20  ;;  %v1348_v16 = vsub.s32 %v1345_v13, %v1347_v14  ;;  %s1543_s17 = sshll.u32 %s2282_s3, 4  ;;  %s1544_s17 = int_to_ptr.vmem [resolvable:$true] %s1543_s17 }
 0x528   :  { %2020 = vmatpush3.bf16.msra.mxu0 %v2158_v19  ;;  %2035 = vmatprep.mubr.msk.bf16.mxu0 %vm2280_vm0, %v2279_v0  ;;  %s2244_s18 = scalar_lea.vmem %s1544_s17, 1024  ;;  %p2249_p11 = scmp.lt.s32.totalorder %s1544_s17, %s1544_s17 }
 0x529   :  { %v869_v25 = vpack.c.bf16 %v868_v23, %v868_v23  ;;  %2021 = vmatprep.subr.bf16.mxu0 %v2279_v0  ;;  %p2245_p10 = scmp.ne.s32.totalorder %s1544_s17, %s2244_s18  ;;  %p2250_p12 = scmp.lt.s32.totalorder %s2244_s18, %s2244_s18 }
 0x52b   :  { %2016 = vmatmul.mubr.bf16.vlgmr.msra.gmra.mrb[20].mxu1 %v869_v25  ;;  %p2251_p13 = por %p2250_p12, %p2249_p11 }
 0x52c   :  { %2022 = vmatpush3.bf16.msra.mxu0 %v2159_v24  ;;  %2040 = vmatpush3.bf16.msra.mxu1 %v2158_v19 }
 0x52d   :  { %2023 = vmatprep.subr.bf16.mxu0 %v2279_v0  ;;  %2041 = vmatprep.subr.bf16.mxu1 %v2279_v0  ;;  %p2252_p0 = pnand %p2251_p13, %p2245_p10 }
 0x52e   :  { %2055 = vmatprep.mubr.msk.bf16.mxu1 %vm2280_vm0, %v2279_v0 }
 0x530   :  { %2024 = vmatpush3.bf16.msra.mxu0 %v2160_v26  ;;  %2042 = vmatpush3.bf16.msra.mxu1 %v2159_v24  ;;  %v1393_v24 = vsub.s32 0, %v1347_v14 }
 0x531   :  { %2025 = vmatprep.subr.bf16.mxu0 %v2279_v0  ;;  %2043 = vmatprep.subr.bf16.mxu1 %v2279_v0 }
 0x534   :  { %2026 = vmatpush3.bf16.msra.mxu0 %v2161_v27  ;;  %2044 = vmatpush3.bf16.msra.mxu1 %v2160_v26 }
 0x535   :  { %2027 = vmatprep.subr.bf16.mxu0 %v2279_v0  ;;  %2045 = vmatprep.subr.bf16.mxu1 %v2279_v0 }
 0x538   :  { %2028 = vmatpush3.bf16.msra.mxu0 %v2162_v28  ;;  %2046 = vmatpush3.bf16.msra.mxu1 %v2161_v27 }
 0x539   :  { %2029 = vmatprep.subr.bf16.mxu0 %v2279_v0  ;;  %2047 = vmatprep.subr.bf16.mxu1 %v2279_v0 }
 0x53c   :  { %2030 = vmatpush3.bf16.msra.mxu0 %v2163_v29  ;;  %2048 = vmatpush3.bf16.msra.mxu1 %v2162_v28 }
 0x53d   :  { %2031 = vmatprep.subr.bf16.mxu0 %v2279_v0  ;;  %2049 = vmatprep.subr.bf16.mxu1 %v2279_v0 }
 0x540   :  { %2050 = vmatpush3.bf16.msra.mxu1 %v2163_v29  ;;  %2032 = vmatpush3.bf16.msra.mxu0 %v2164_v30 }
 0x541   :  { %2051 = vmatprep.subr.bf16.mxu1 %v2279_v0  ;;  %2033 = vmatprep.subr.bf16.mxu0 %v2279_v0 }
 0x544   :  { %2052 = vmatpush3.bf16.msra.mxu1 %v2164_v30  ;;  %2034 = vmatpush3.bf16.msra.mxu0 %v2165_v31 }
 0x545   :  { %2053 = vmatprep.subr.bf16.mxu1 %v2279_v0  ;;  %2059 = vmatprep.subr.bf16.mxu0 %v2279_v0 }
 0x548   :  { %2054 = vmatpush3.bf16.msra.mxu1 %v2165_v31 }
 0x549   :  { %2079 = vmatprep.subr.bf16.mxu1 %v2279_v0 }
 0x5fa   :  { %v977_v33 = vpop.f32.mrb[20].mxu0 }
 0x5fb   :  { %v978_v34 = vadd.f32 %v1606_v32, %v977_v33  ;;  %v1997_v35 = vpop.f32.mrb[21].mxu0 }
 0x5fc   :  { %v980_v36 = vpop.f32.mrb[22].mxu0 }
 0x5fd   :  { %v1023_v37 = vmul.f32 0.2, %v978_v34  ;;  %v1998_v38 = vpop.f32.mrb[23].mxu0 }
 0x5fe   :  { %v1017_v39 = vpop.f32.mrb[20].mxu1 }
 0x5ff   :  { %v1024_v40 = vmax.f32 %v978_v34, %v1023_v37  ;;  %v1018_v41 = vadd.f32 %v1606_v32, %v1017_v39  ;;  %v2017_v42 = vpop.f32.mrb[21].mxu1 }
 0x600   :  { %v1020_v43 = vpop.f32.mrb[22].mxu1 }
 0x601   :  { %v1025_v45 = vpack.c.bf16 %v1024_v40, %v1024_v40  ;;  %v1026_v46 = vmul.f32 0.2, %v1018_v41  ;;  %v2018_v47 = vpop.f32.mrb[23].mxu1 }
 0x603   :  { %v1027_v48 = vmax.f32 %v1018_v41, %v1026_v46  ;;  %2036 = vmatmul.mubr.bf16.vlgmr.msra.gmra.mrb[24].mxu0 %v1025_v45 }
 0x604   :  { %2060 = vmatpush3.bf16.msra.mxu0 %v2166_v44  ;;  %2075 = vmatprep.mubr.msk.bf16.mxu0 %vm2280_vm0, %v2279_v0 }
 0x605   :  { %v1028_v50 = vpack.c.bf16 %v1027_v48, %v1027_v48  ;;  %2061 = vmatprep.subr.bf16.mxu0 %v2279_v0 }
 0x607   :  { %2056 = vmatmul.mubr.bf16.vlgmr.msra.gmra.mrb[24].mxu1 %v1028_v50 }
 0x608   :  { %2062 = vmatpush3.bf16.msra.mxu0 %v2167_v49  ;;  %2080 = vmatpush3.bf16.msra.mxu1 %v2166_v44 }
 0x609   :  { %2063 = vmatprep.subr.bf16.mxu0 %v2279_v0  ;;  %2081 = vmatprep.subr.bf16.mxu1 %v2279_v0 }
 0x60a   :  { %2095 = vmatprep.mubr.msk.bf16.mxu1 %vm2280_vm0, %v2279_v0 }
 0x60c   :  { %2064 = vmatpush3.bf16.msra.mxu0 %v2168_v51  ;;  %2082 = vmatpush3.bf16.msra.mxu1 %v2167_v49 }
 0x60d   :  { %2065 = vmatprep.subr.bf16.mxu0 %v2279_v0  ;;  %2083 = vmatprep.subr.bf16.mxu1 %v2279_v0 }
 0x610   :  { %2066 = vmatpush3.bf16.msra.mxu0 %v2169_v52  ;;  %2084 = vmatpush3.bf16.msra.mxu1 %v2168_v51 }
 0x611   :  { %2067 = vmatprep.subr.bf16.mxu0 %v2279_v0  ;;  %2085 = vmatprep.subr.bf16.mxu1 %v2279_v0 }
 0x614   :  { %2068 = vmatpush3.bf16.msra.mxu0 %v2170_v53  ;;  %2086 = vmatpush3.bf16.msra.mxu1 %v2169_v52 }
 0x615   :  { %2069 = vmatprep.subr.bf16.mxu0 %v2279_v0  ;;  %2087 = vmatprep.subr.bf16.mxu1 %v2279_v0 }
 0x618   :  { %2070 = vmatpush3.bf16.msra.mxu0 %v2171_v54  ;;  %2088 = vmatpush3.bf16.msra.mxu1 %v2170_v53 }
 0x619   :  { %2071 = vmatprep.subr.bf16.mxu0 %v2279_v0  ;;  %2089 = vmatprep.subr.bf16.mxu1 %v2279_v0 }
 0x61c   :  { %2090 = vmatpush3.bf16.msra.mxu1 %v2171_v54  ;;  %2072 = vmatpush3.bf16.msra.mxu0 %v2172_v55 }
 0x61d   :  { %2091 = vmatprep.subr.bf16.mxu1 %v2279_v0  ;;  %2073 = vmatprep.subr.bf16.mxu0 %v2279_v0 }
 0x620   :  { %2092 = vmatpush3.bf16.msra.mxu1 %v2172_v55  ;;  %2074 = vmatpush3.bf16.msra.mxu0 %v2173_v56 }
 0x621   :  { %2093 = vmatprep.subr.bf16.mxu1 %v2279_v0 }
 0x624   :  { %2094 = vmatpush3.bf16.msra.mxu1 %v2173_v56 }
 0x6d6   :  { %v1136_v58 = vpop.f32.mrb[24].mxu0 }
 0x6d7   :  { %v1137_v59 = vadd.f32 %v1616_v57, %v1136_v58  ;;  %v2037_v60 = vpop.f32.mrb[25].mxu0 }
 0x6d8   :  { %v1139_v61 = vpop.f32.mrb[26].mxu0 }
 0x6d9   :  { %v1182_v62 = vmul.f32 0.2, %v1137_v59  ;;  %v2038_v63 = vpop.f32.mrb[27].mxu0 }
 0x6da   :  { %v1176_v1 = vpop.f32.mrb[24].mxu1 }
 0x6db   :  { %v1183_v2 = vmax.f32 %v1137_v59, %v1182_v62  ;;  %v1177_v3 = vadd.f32 %v1616_v57, %v1176_v1  ;;  %v2057_v4 = vpop.f32.mrb[25].mxu1 }
 0x6dc   :  { %v1179_v5 = vpop.f32.mrb[26].mxu1 }
 0x6dd   :  { %v1184_v6 = vpack.c.bf16 %v1183_v2, %v1183_v2  ;;  %v1185_v0 = vmul.f32 0.2, %v1177_v3  ;;  %v2058_v7 = vpop.f32.mrb[27].mxu1 }
 0x6df   :  { %v1186_v8 = vmax.f32 %v1177_v3, %v1185_v0  ;;  %2076 = vmatmul.mubr.bf16.vlgmr.msra.gmra.mrb[28].mxu0 %v1184_v6 }
 0x6e1   :  { %v1187_v9 = vpack.c.bf16 %v1186_v8, %v1186_v8 }
 0x6e3   :  { %2096 = vmatmul.mubr.bf16.vlgmr.msra.gmra.mrb[28].mxu1 %v1187_v9 }
 0x7b2   :  { %v1295_v17 = vpop.f32.mrb[28].mxu0 }
 0x7b3   :  { %v1296_v18 = vadd.f32 %v1626_v15, %v1295_v17  ;;  %v2077_v19 = vpop.f32.mrb[29].mxu0 }
 0x7b4   :  { %v1298_v20 = vpop.f32.mrb[30].mxu0 }
 0x7b5   :  { %v1342_v21 = vcombine.high %v1296_v18, %v1296_v18  ;;  %v1349_v22 = vrot.slane %v1296_v18, %v1348_v16  ;;  %v2078_v23 = vpop.f32.mrb[31].mxu0 }
 0x7b6   :  { %v1335_v25 = vpop.f32.mrb[28].mxu1 }
 0x7b7   :  { %v1356_v26 = vrot.slane %v1342_v21, %v1348_v16  ;;  %v1357_v27 = vcombine.high %v1349_v22, %v1349_v22  ;;  %v1365_v28 = vrot.slane %v1349_v22, %v1348_v16  ;;  %v1336_v29 = vadd.f32 %v1626_v15, %v1335_v25  ;;  %v2097_v30 = vpop.f32.mrb[29].mxu1 }
 0x7b8   :  { %v1338_v31 = vpop.f32.mrb[30].mxu1 }
 0x7b9   :  { %v1358_v32 = vcombine.high %v1356_v26, %v1356_v26  ;;  %v1372_v33 = vrot.slane %v1356_v26, %v1348_v16  ;;  %v1379_v34 = vrot.slane %v1357_v27, %v1348_v16  ;;  %v1387_v35 = vcombine.high %v1365_v28, %v1365_v28  ;;  %v2098_v36 = vpop.f32.mrb[31].mxu1 }
 0x7ba   :  { %v1394_v37 = vrot.slane %v1365_v28, %v1393_v24  ;;  %v1440_v38 = vcombine.high %v1336_v29, %v1336_v29  ;;  %v1447_v39 = vrot.slane %v1336_v29, %v1348_v16 }
 0x7bb   :  { %v1386_v40 = vrot.slane %v1358_v32, %v1348_v16  ;;  %v1388_v41 = vcombine.high %v1372_v33, %v1372_v33  ;;  %v1389_v42 = vcombine.high %v1379_v34, %v1379_v34  ;;  %v1398_v43 = vrot.slane %v1379_v34, %v1393_v24 }
 0x7bc   :  { %v1402_v44 = vrot.slane %v1387_v35, %v1393_v24  ;;  %v1410_v45 = vrot.slane %v1372_v33, %v1393_v24  ;;  %1431 = vst [vmem:[#allocation8] sm:$0xf] %v1394_v37  ;;  %v1454_v46 = vrot.slane %v1440_v38, %v1348_v16  ;;  %v1455_v47 = vcombine.high %v1447_v39, %v1447_v39 }
 0x7bd   :  { %v1390_v48 = vcombine.high %v1386_v40, %v1386_v40  ;;  %v1406_v49 = vrot.slane %v1389_v42, %v1393_v24  ;;  %v1414_v50 = vrot.slane %v1386_v40, %v1393_v24  ;;  %v1418_v51 = vrot.slane %v1388_v41, %v1393_v24  ;;  %1432 = vst [vmem:[#allocation8 + $0x4] sm:$0xf] %v1398_v43 }
 0x7be   :  { %1433 = vst [vmem:[#allocation8 + $0x8] sm:$0xf] %v1402_v44  ;;  %1435 = vst [vmem:[#allocation8 + $0x10] sm:$0xf] %v1410_v45  ;;  %v1456_v52 = vcombine.high %v1454_v46, %v1454_v46  ;;  %v1463_v53 = vrot.slane %v1447_v39, %v1348_v16  ;;  %v1470_v54 = vrot.slane %v1454_v46, %v1348_v16 }
 0x7bf   :  { %v1477_v55 = vrot.slane %v1455_v47, %v1348_v16  ;;  %v1422_v56 = vrot.slane %v1390_v48, %v1393_v24  ;;  %1434 = vst [vmem:[#allocation8 + $0xc] sm:$0xf] %v1406_v49  ;;  %1436 = vst [vmem:[#allocation8 + $0x14] sm:$0xf] %v1414_v50 }
 0x7c0   :  { %1437 = vst [vmem:[#allocation8 + $0x18] sm:$0xf] %v1418_v51  ;;  %v1484_v57 = vrot.slane %v1456_v52, %v1348_v16  ;;  %v1485_v58 = vcombine.high %v1463_v53, %v1463_v53  ;;  %v1486_v59 = vcombine.high %v1470_v54, %v1470_v54  ;;  %v1492_v61 = vrot.slane %v1463_v53, %v1393_v24 }
 0x7c1   :  { %v1487_v60 = vcombine.high %v1477_v55, %v1477_v55  ;;  %1438 = vst [vmem:[#allocation8 + $0x1c] sm:$0xf] %v1422_v56  ;;  %v1496_v62 = vrot.slane %v1477_v55, %v1393_v24  ;;  %v1508_v63 = vrot.slane %v1470_v54, %v1393_v24 }
 0x7c2   :  { %v1488_v1 = vcombine.high %v1484_v57, %v1484_v57  ;;  %v1500_v2 = vrot.slane %v1485_v58, %v1393_v24  ;;  %v1512_v4 = vrot.slane %v1484_v57, %v1393_v24  ;;  %v1516_v5 = vrot.slane %v1486_v59, %v1393_v24  ;;  %1530 = vst [vmem:[#allocation8 + $0x20] sm:$0xf] %v1492_v61 }
 0x7c3   :  { %v1504_v3 = vrot.slane %v1487_v60, %v1393_v24  ;;  %1531 = vst [vmem:[#allocation8 + $0x24] sm:$0xf] %v1496_v62  ;;  %1534 = vst [vmem:[#allocation8 + $0x30] sm:$0xf] %v1508_v63 }
 0x7c4   :  { %v1520_v6 = vrot.slane %v1488_v1, %v1393_v24  ;;  %1532 = vst [vmem:[#allocation8 + $0x28] sm:$0xf] %v1500_v2  ;;  %1535 = vst [vmem:[#allocation8 + $0x34] sm:$0xf] %v1512_v4 }
 0x7c5   :  { %1533 = vst [vmem:[#allocation8 + $0x2c] sm:$0xf] %v1504_v3  ;;  %1536 = vst [vmem:[#allocation8 + $0x38] sm:$0xf] %v1516_v5 }
 0x7c6   :  { %1537 = vst [vmem:[#allocation8 + $0x3c] sm:$0xf] %v1520_v6 }
 0x7c7   :  { %2255 = shalt.err (!%p2252_p0)
}
 0x7c8   :  { %s2256_s21 = scalar_lea.hbm %s2553_s4, 1024 }
 0x7c9   :  { %p2257_p1 = scmp.ne.s32.totalorder %s2553_s4, %s2256_s21  ;;  %p2260_p2 = scmp.lt.u32.totalorder %s2256_s21, %s2553_s4 }
 0x7cb   :  { %p2262_p3 = pnand %p2260_p2, %p2257_p1 }
 0x7cd   :  { %2265 = shalt.err (!%p2262_p3)
}
 0x7ce   :  { %1549 = dma.vmem_to_hbm [thread:$0]  %s1544_s17, 1024, %s2553_s4, [#allocation4], %s2273_s25, %s2273_s25, %s2274_s26  }
 0x7cf   :  { %2270 = dma.done.wait [#allocation4], 1024  }
 0x7d0   :  { %2271 = vsyncadd [#allocation4], 4294966272 }
 0x7d1   :  { %1553 = vsyncpa [#allocation3], 1 }
 0x7d2   :  { %1554 = vsyncpa [#allocation6], 1 }
 0x7d3   :  { %1555 = vsyncpa [#allocation4], 1 }

// kernel: tpu_custom_call.1
= control target key start
LH: loop header
LB: loop body
LE: loop exit
PB: predicated region body
PF: predicated region fallthrough
CT: control target
= control target key end

     0   :  { %9 = vsyncpa [#allocation3], 0  ;;  %s2549_s0 = inlined_call_operand.hbm [shape: f32[16,128], index: 0, kind: input, shape index: {}]   ;;  %s2550_s1 = inlined_call_operand.hbm [shape: bf16[128,128], index: 1, kind: input, shape index: {}]   ;;  %s2551_s2 = inlined_call_operand.hbm [shape: bf16[7,128,128], index: 2, kind: input, shape index: {}]   ;;  %s2552_s3 = inlined_call_operand.vmem [shape: f32[8,1,128], index: 3, kind: input, shape index: {}]   ;;  %s2553_s4 = inlined_call_operand.hbm [shape: f32[16,4,128], index: 4, kind: output, shape index: {}]  }
   0x1   :  { %10 = vsyncpa [#allocation6], 0 }
   0x2   :  { %11 = vsyncpa [#allocation4], 0  ;;  %s2272_s15 = smov [#allocation5]   ;;  %s2178_s19 = scalar_lea.hbm %s2550_s1, 1024 }
   0x3   :  { %s29_s16 = sshll.u32 %s2272_s15, 4  ;;  %p2179_p0 = scmp.ne.s32.totalorder %s2550_s1, %s2178_s19  ;;  %s30_s16 = int_to_ptr.vmem [resolvable:$true] %s29_s16 }
   0x4   :  { %p2182_p1 = scmp.lt.u32.totalorder %s2178_s19, %s2550_s1 }
   0x6   :  { %p2184_p2 = pnand %p2182_p1, %p2179_p0 }
   0x8   :  { %2187 = shalt.err (!%p2184_p2)
}
   0x9   :  { %s2188_s24 = scalar_lea.vmem %s30_s16, 1024  ;;  %p2193_p4 = scmp.lt.s32.totalorder %s30_s16, %s30_s16 }
   0xa   :  { %p2189_p3 = scmp.ne.s32.totalorder %s30_s16, %s2188_s24  ;;  %p2194_p5 = scmp.lt.s32.totalorder %s2188_s24, %s2188_s24 }
   0xc   :  { %p2195_p6 = por %p2194_p5, %p2193_p4 }
   0xe   :  { %p2196_p7 = pnand %p2195_p6, %p2189_p3 }
  0x10   :  { %2199 = shalt.err (!%p2196_p7)
}
  0x11   :  { %s2273_s25 = smov 64   ;;  %s2274_s26 = smov 4  }
  0x12   :  { %35 = dma.hbm_to_vmem [thread:$0]  %s2550_s1, 1024, %s30_s16, [#allocation6], %s2273_s25, %s2273_s25, %s2274_s26  }
  0x13   :  { %s2275_s29 = smov [#allocation2]   ;;  %s2200_s7 = scalar_lea.hbm %s2549_s0, 256 }
  0x14   :  { %s17_s30 = sshll.u32 %s2275_s29, 4  ;;  %p2201_p8 = scmp.ne.s32.totalorder %s2549_s0, %s2200_s7  ;;  %s18_s30 = int_to_ptr.vmem [resolvable:$true] %s17_s30 }
  0x15   :  { %p2204_p9 = scmp.lt.u32.totalorder %s2200_s7, %s2549_s0 }
  0x17   :  { %p2206_p10 = pnand %p2204_p9, %p2201_p8 }
  0x19   :  { %2209 = shalt.err (!%p2206_p10)
}
  0x1a   :  { %s2210_s12 = scalar_lea.vmem %s18_s30, 256  ;;  %p2215_p12 = scmp.lt.s32.totalorder %s18_s30, %s18_s30 }
  0x1b   :  { %p2211_p11 = scmp.ne.s32.totalorder %s18_s30, %s2210_s12  ;;  %p2216_p13 = scmp.lt.s32.totalorder %s2210_s12, %s2210_s12 }
  0x1d   :  { %p2217_p0 = por %p2216_p13, %p2215_p12 }
  0x1f   :  { %p2218_p1 = pnand %p2217_p0, %p2211_p11 }
  0x21   :  { %2221 = shalt.err (!%p2218_p1)
}
  0x22   :  { %s2276_s1 = smov 128   ;;  %s2277_s13 = smov 8  }
  0x23   :  { %23 = dma.hbm_to_vmem [thread:$0]  %s2549_s0, 256, %s18_s30, [#allocation3], %s2276_s1, %s2276_s1, %s2277_s13  }
  0x24   :  { %s2278_s16 = smov [#allocation7]   ;;  %s2222_s20 = scalar_lea.hbm %s2551_s2, 7168 }
  0x25   :  { %s41_s17 = sshll.u32 %s2278_s16, 4  ;;  %p2223_p2 = scmp.ne.s32.totalorder %s2551_s2, %s2222_s20  ;;  %s42_s17 = int_to_ptr.vmem [resolvable:$true] %s41_s17 }
  0x26   :  { %p2226_p3 = scmp.lt.u32.totalorder %s2222_s20, %s2551_s2 }
  0x28   :  { %p2228_p4 = pnand %p2226_p3, %p2223_p2 }
  0x2a   :  { %2231 = shalt.err (!%p2228_p4)
}
  0x2b   :  { %s2232_s27 = scalar_lea.vmem %s42_s17, 7168  ;;  %p2237_p6 = scmp.lt.s32.totalorder %s42_s17, %s42_s17 }
  0x2c   :  { %p2233_p5 = scmp.ne.s32.totalorder %s42_s17, %s2232_s27  ;;  %p2238_p7 = scmp.lt.s32.totalorder %s2232_s27, %s2232_s27 }
  0x2e   :  { %p2239_p8 = por %p2238_p7, %p2237_p6 }
  0x30   :  { %p2240_p9 = pnand %p2239_p8, %p2233_p5 }
  0x32   :  { %2243 = shalt.err (!%p2240_p9)
}
  0x33   :  { %47 = dma.hbm_to_vmem [thread:$0]  %s2551_s2, 7168, %s42_s17, [#allocation6], %s2273_s25, %s2273_s25, %s2274_s26  }
  0x34   :  { %2266 = dma.done.wait [#allocation3], 256  }
  0x35   :  { %2267 = vsyncadd [#allocation3], 4294967040 }
  0x36   :  { %2268 = dma.done.wait [#allocation6], 8192  }
  0x37   :  { %2269 = vsyncadd [#allocation6], 4294959104  ;;  %v2279_v0 = vmov 0.0   ;;  %v60_v1 = vld [vmem:[#allocation2] sm:$0xff]  ;;  %v61_v2 = vld [vmem:[#allocation2 + $0x8] sm:$0xff]  ;;  %vm2280_vm0 = vmmov 0  }
  0x38   :  { %1779 = vmatprep.subr.bf16.mxu0 %v2279_v0  ;;  %1799 = vmatprep.subr.bf16.mxu1 %v2279_v0  ;;  %v62_v3 = vmul.f32 %v60_v1, %v60_v1  ;;  %v2110_v4 = vld [vmem:[#allocation5] sm:$0xff]   ;;  %v63_v5 = vmul.f32 %v61_v2, %v61_v2  ;;  %v2111_v6 = vld [vmem:[#allocation5 + $0x8] sm:$0xff]   ;;  %v2112_v7 = vld [vmem:[#allocation5 + $0x10] sm:$0xff]  }
  0x39   :  { %1780 = vmatpush3.bf16.msra.mxu0 %v2110_v4  ;;  %1800 = vmatpush3.bf16.msra.mxu1 %v2110_v4  ;;  %v2113_v8 = vld [vmem:[#allocation5 + $0x18] sm:$0xff]   ;;  %v2114_v9 = vld [vmem:[#allocation5 + $0x20] sm:$0xff]   ;;  %v2115_v10 = vld [vmem:[#allocation5 + $0x28] sm:$0xff]  }
  0x3a   :  { %64 = vadd.xlane.f32.xlu0 %v62_v3  ;;  %1781 = vmatprep.subr.bf16.mxu0 %v2279_v0  ;;  %v2116_v11 = vld [vmem:[#allocation5 + $0x30] sm:$0xff]   ;;  %v2117_v12 = vld [vmem:[#allocation5 + $0x38] sm:$0xff]   ;;  %v2118_v21 = vld [vmem:[#allocation7] sm:$0xff]  }
  0x3b   :  { %1801 = vmatprep.subr.bf16.mxu1 %v2279_v0  ;;  %1795 = vmatprep.mubr.msk.bf16.mxu0 %vm2280_vm0, %v2279_v0  ;;  %v2119_v25 = vld [vmem:[#allocation7 + $0x8] sm:$0xff]   ;;  %v2120_v27 = vld [vmem:[#allocation7 + $0x10] sm:$0xff]   ;;  %v2121_v28 = vld [vmem:[#allocation7 + $0x18] sm:$0xff]  }
  0x3c   :  { %1815 = vmatprep.mubr.msk.bf16.mxu1 %vm2280_vm0, %v2279_v0  ;;  %v2122_v29 = vld [vmem:[#allocation7 + $0x20] sm:$0xff]   ;;  %v2123_v30 = vld [vmem:[#allocation7 + $0x28] sm:$0xff]   ;;  %v2124_v31 = vld [vmem:[#allocation7 + $0x30] sm:$0xff]  }
  0x3d   :  { %1782 = vmatpush3.bf16.msra.mxu0 %v2111_v6  ;;  %1802 = vmatpush3.bf16.msra.mxu1 %v2111_v6  ;;  %v2125_v32 = vld [vmem:[#allocation7 + $0x38] sm:$0xff]   ;;  %v1556_v33 = vld [vmem:[%s2552_s3] ss:$0 sm:$0xff]  ;;  %v2126_v45 = vld [vmem:[#allocation7 + $0x40] sm:$0xff]  }
  0x3e   :  { %66 = vadd.xlane.f32.xlu0 %v63_v5  ;;  %1783 = vmatprep.subr.bf16.mxu0 %v2279_v0  ;;  %v2127_v50 = vld [vmem:[#allocation7 + $0x48] sm:$0xff]   ;;  %v2128_v52 = vld [vmem:[#allocation7 + $0x50] sm:$0xff]   ;;  %v2129_v53 = vld [vmem:[#allocation7 + $0x58] sm:$0xff]  }
  0x3f   :  { %1803 = vmatprep.subr.bf16.mxu1 %v2279_v0  ;;  %v2130_v54 = vld [vmem:[#allocation7 + $0x60] sm:$0xff]   ;;  %v2131_v55 = vld [vmem:[#allocation7 + $0x68] sm:$0xff]   ;;  %v2132_v56 = vld [vmem:[#allocation7 + $0x70] sm:$0xff]  }
  0x40   :  { %v2133_v57 = vld [vmem:[#allocation7 + $0x78] sm:$0xff]   ;;  %v1566_v58 = vld [vmem:[%s2552_s3 + $0x1] ss:$0 sm:$0xff] }
  0x41   :  { %1784 = vmatpush3.bf16.msra.mxu0 %v2112_v7  ;;  %1804 = vmatpush3.bf16.msra.mxu1 %v2112_v7  ;;  %v2134_v7 = vld [vmem:[#allocation7 + $0x80] sm:$0xff]  }
  0x42   :  { %1785 = vmatprep.subr.bf16.mxu0 %v2279_v0  ;;  %1805 = vmatprep.subr.bf16.mxu1 %v2279_v0 }
  0x45   :  { %1786 = vmatpush3.bf16.msra.mxu0 %v2113_v8  ;;  %1806 = vmatpush3.bf16.msra.mxu1 %v2113_v8 }
  0x46   :  { %1787 = vmatprep.subr.bf16.mxu0 %v2279_v0  ;;  %1807 = vmatprep.subr.bf16.mxu1 %v2279_v0 }
  0x49   :  { %1788 = vmatpush3.bf16.msra.mxu0 %v2114_v9  ;;  %1808 = vmatpush3.bf16.msra.mxu1 %v2114_v9 }
  0x4a   :  { %1789 = vmatprep.subr.bf16.mxu0 %v2279_v0  ;;  %1809 = vmatprep.subr.bf16.mxu1 %v2279_v0 }
  0x4d   :  { %1790 = vmatpush3.bf16.msra.mxu0 %v2115_v10  ;;  %1810 = vmatpush3.bf16.msra.mxu1 %v2115_v10 }
  0x4e   :  { %1791 = vmatprep.subr.bf16.mxu0 %v2279_v0  ;;  %1811 = vmatprep.subr.bf16.mxu1 %v2279_v0 }
  0x51   :  { %1792 = vmatpush3.bf16.msra.mxu0 %v2116_v11  ;;  %1812 = vmatpush3.bf16.msra.mxu1 %v2116_v11 }
  0x52   :  { %1793 = vmatprep.subr.bf16.mxu0 %v2279_v0  ;;  %1813 = vmatprep.subr.bf16.mxu1 %v2279_v0 }
  0x55   :  { %1794 = vmatpush3.bf16.msra.mxu0 %v2117_v12  ;;  %1814 = vmatpush3.bf16.msra.mxu1 %v2117_v12  ;;  %v2135_v12 = vld [vmem:[#allocation7 + $0x88] sm:$0xff]  }
  0x56   :  { %1819 = vmatprep.subr.bf16.mxu0 %v2279_v0  ;;  %1839 = vmatprep.subr.bf16.mxu1 %v2279_v0 }
  0xc7   :  { %v65_v13 = vpop.xlane.xlu0 %64 }
  0xc8   :  { %v68_v14 = vmul.f32 0.03125, %v65_v13 }
  0xca   :  { %v70_v15 = vadd.f32 1e-08, %v68_v14  ;;  %v2136_v14 = vld [vmem:[#allocation7 + $0x90] sm:$0xff]  }
  0xcb   :  { %v67_v16 = vpop.xlane.xlu0 %66 }
  0xcc   :  { %2174 = vrsqrt.f32 %v70_v15  ;;  %v69_v17 = vmul.f32 0.03125, %v67_v16  ;;  %v2137_v15 = vld [vmem:[#allocation7 + $0x98] sm:$0xff]   ;;  %v2138_v16 = vld [vmem:[#allocation7 + $0xa0] sm:$0xff]  }
  0xce   :  { %v71_v18 = vadd.f32 1e-08, %v69_v17  ;;  %v2139_v17 = vld [vmem:[#allocation7 + $0xa8] sm:$0xff]  }
  0xd0   :  { %2176 = vrsqrt.f32 %v71_v18  ;;  %v2140_v18 = vld [vmem:[#allocation7 + $0xb0] sm:$0xff]  }
  0xd6   :  { %v2175_v19 = vpop.eup %2174 }
  0xd7   :  { %v74_v20 = vmul.f32 %v2175_v19, %v60_v1  ;;  %v2141_v19 = vld [vmem:[#allocation7 + $0xb8] sm:$0xff]  }
  0xd9   :  { %v76_v22 = vpack.c.bf16 %v74_v20, %v74_v20  ;;  %v1576_v20 = vld [vmem:[%s2552_s3 + $0x2] ss:$0 sm:$0xff] }
  0xda   :  { %v2177_v23 = vpop.eup %2176 }
  0xdb   :  { %1796 = vmatmul.mubr.bf16.vlgmr.msra.gmra.mrb[0].mxu0 %v76_v22  ;;  %v75_v24 = vmul.f32 %v2177_v23, %v61_v2 }
  0xdc   :  { %1820 = vmatpush3.bf16.msra.mxu0 %v2118_v21  ;;  %1835 = vmatprep.mubr.msk.bf16.mxu0 %vm2280_vm0, %v2279_v0 }
  0xdd   :  { %v77_v26 = vpack.c.bf16 %v75_v24, %v75_v24  ;;  %1821 = vmatprep.subr.bf16.mxu0 %v2279_v0 }
  0xdf   :  { %1816 = vmatmul.mubr.bf16.vlgmr.msra.gmra.mrb[0].mxu1 %v77_v26 }
  0xe0   :  { %1822 = vmatpush3.bf16.msra.mxu0 %v2119_v25  ;;  %1840 = vmatpush3.bf16.msra.mxu1 %v2118_v21 }
  0xe1   :  { %1823 = vmatprep.subr.bf16.mxu0 %v2279_v0  ;;  %1841 = vmatprep.subr.bf16.mxu1 %v2279_v0 }
  0xe2   :  { %1855 = vmatprep.mubr.msk.bf16.mxu1 %vm2280_vm0, %v2279_v0 }
  0xe4   :  { %1824 = vmatpush3.bf16.msra.mxu0 %v2120_v27  ;;  %1842 = vmatpush3.bf16.msra.mxu1 %v2119_v25 }
  0xe5   :  { %1825 = vmatprep.subr.bf16.mxu0 %v2279_v0  ;;  %1843 = vmatprep.subr.bf16.mxu1 %v2279_v0 }
  0xe8   :  { %1826 = vmatpush3.bf16.msra.mxu0 %v2121_v28  ;;  %1844 = vmatpush3.bf16.msra.mxu1 %v2120_v27 }
  0xe9   :  { %1827 = vmatprep.subr.bf16.mxu0 %v2279_v0  ;;  %1845 = vmatprep.subr.bf16.mxu1 %v2279_v0 }
  0xec   :  { %1828 = vmatpush3.bf16.msra.mxu0 %v2122_v29  ;;  %1846 = vmatpush3.bf16.msra.mxu1 %v2121_v28 }
  0xed   :  { %1829 = vmatprep.subr.bf16.mxu0 %v2279_v0  ;;  %1847 = vmatprep.subr.bf16.mxu1 %v2279_v0 }
  0xf0   :  { %1830 = vmatpush3.bf16.msra.mxu0 %v2123_v30  ;;  %1848 = vmatpush3.bf16.msra.mxu1 %v2122_v29 }
  0xf1   :  { %1831 = vmatprep.subr.bf16.mxu0 %v2279_v0  ;;  %1849 = vmatprep.subr.bf16.mxu1 %v2279_v0 }
  0xf4   :  { %1850 = vmatpush3.bf16.msra.mxu1 %v2123_v30  ;;  %1832 = vmatpush3.bf16.msra.mxu0 %v2124_v31 }
  0xf5   :  { %1851 = vmatprep.subr.bf16.mxu1 %v2279_v0  ;;  %1833 = vmatprep.subr.bf16.mxu0 %v2279_v0 }
  0xf8   :  { %1852 = vmatpush3.bf16.msra.mxu1 %v2124_v31  ;;  %1834 = vmatpush3.bf16.msra.mxu0 %v2125_v32 }
  0xf9   :  { %1853 = vmatprep.subr.bf16.mxu1 %v2279_v0  ;;  %1859 = vmatprep.subr.bf16.mxu0 %v2279_v0 }
  0xfc   :  { %1854 = vmatpush3.bf16.msra.mxu1 %v2125_v32  ;;  %v2142_v32 = vld [vmem:[#allocation7 + $0xc0] sm:$0xff]  }
  0xfd   :  { %1879 = vmatprep.subr.bf16.mxu1 %v2279_v0 }
 0x1ae   :  { %v183_v34 = vpop.f32.mrb[0].mxu0 }
 0x1af   :  { %v184_v35 = vadd.f32 %v1556_v33, %v183_v34  ;;  %v1797_v36 = vpop.f32.mrb[1].mxu0 }
 0x1b0   :  { %v186_v37 = vpop.f32.mrb[2].mxu0 }
 0x1b1   :  { %v229_v38 = vmul.f32 0.2, %v184_v35  ;;  %v1798_v39 = vpop.f32.mrb[3].mxu0  ;;  %v2143_v37 = vld [vmem:[#allocation7 + $0xc8] sm:$0xff]  }
 0x1b2   :  { %v223_v40 = vpop.f32.mrb[0].mxu1  ;;  %v2144_v39 = vld [vmem:[#allocation7 + $0xd0] sm:$0xff]  }
 0x1b3   :  { %v230_v41 = vmax.f32 %v184_v35, %v229_v38  ;;  %v224_v42 = vadd.f32 %v1556_v33, %v223_v40  ;;  %v1817_v43 = vpop.f32.mrb[1].mxu1  ;;  %v2145_v40 = vld [vmem:[#allocation7 + $0xd8] sm:$0xff]  }
 0x1b4   :  { %v226_v44 = vpop.f32.mrb[2].mxu1  ;;  %v2148_v43 = vld [vmem:[#allocation7 + $0xf0] sm:$0xff]  }
 0x1b5   :  { %v231_v46 = vpack.c.bf16 %v230_v41, %v230_v41  ;;  %v232_v47 = vmul.f32 0.2, %v224_v42  ;;  %v1818_v48 = vpop.f32.mrb[3].mxu1  ;;  %v2146_v41 = vld [vmem:[#allocation7 + $0xe0] sm:$0xff]   ;;  %v2149_v44 = vld [vmem:[#allocation7 + $0xf8] sm:$0xff]  }
 0x1b7   :  { %v233_v49 = vmax.f32 %v224_v42, %v232_v47  ;;  %1836 = vmatmul.mubr.bf16.vlgmr.msra.gmra.mrb[4].mxu0 %v231_v46  ;;  %v2147_v42 = vld [vmem:[#allocation7 + $0xe8] sm:$0xff]  }
 0x1b8   :  { %1860 = vmatpush3.bf16.msra.mxu0 %v2126_v45  ;;  %1875 = vmatprep.mubr.msk.bf16.mxu0 %vm2280_vm0, %v2279_v0 }
 0x1b9   :  { %v234_v51 = vpack.c.bf16 %v233_v49, %v233_v49  ;;  %1861 = vmatprep.subr.bf16.mxu0 %v2279_v0 }
 0x1bb   :  { %1856 = vmatmul.mubr.bf16.vlgmr.msra.gmra.mrb[4].mxu1 %v234_v51 }
 0x1bc   :  { %1862 = vmatpush3.bf16.msra.mxu0 %v2127_v50  ;;  %1880 = vmatpush3.bf16.msra.mxu1 %v2126_v45  ;;  %v1586_v45 = vld [vmem:[%s2552_s3 + $0x3] ss:$0 sm:$0xff] }
 0x1bd   :  { %1863 = vmatprep.subr.bf16.mxu0 %v2279_v0  ;;  %1881 = vmatprep.subr.bf16.mxu1 %v2279_v0 }
 0x1be   :  { %1895 = vmatprep.mubr.msk.bf16.mxu1 %vm2280_vm0, %v2279_v0 }
 0x1c0   :  { %1864 = vmatpush3.bf16.msra.mxu0 %v2128_v52  ;;  %1882 = vmatpush3.bf16.msra.mxu1 %v2127_v50 }
 0x1c1   :  { %1865 = vmatprep.subr.bf16.mxu0 %v2279_v0  ;;  %1883 = vmatprep.subr.bf16.mxu1 %v2279_v0 }
 0x1c4   :  { %1866 = vmatpush3.bf16.msra.mxu0 %v2129_v53  ;;  %1884 = vmatpush3.bf16.msra.mxu1 %v2128_v52 }
 0x1c5   :  { %1867 = vmatprep.subr.bf16.mxu0 %v2279_v0  ;;  %1885 = vmatprep.subr.bf16.mxu1 %v2279_v0 }
 0x1c8   :  { %1868 = vmatpush3.bf16.msra.mxu0 %v2130_v54  ;;  %1886 = vmatpush3.bf16.msra.mxu1 %v2129_v53 }
 0x1c9   :  { %1869 = vmatprep.subr.bf16.mxu0 %v2279_v0  ;;  %1887 = vmatprep.subr.bf16.mxu1 %v2279_v0 }
 0x1cc   :  { %1870 = vmatpush3.bf16.msra.mxu0 %v2131_v55  ;;  %1888 = vmatpush3.bf16.msra.mxu1 %v2130_v54 }
 0x1cd   :  { %1871 = vmatprep.subr.bf16.mxu0 %v2279_v0  ;;  %1889 = vmatprep.subr.bf16.mxu1 %v2279_v0 }
 0x1d0   :  { %1890 = vmatpush3.bf16.msra.mxu1 %v2131_v55  ;;  %1872 = vmatpush3.bf16.msra.mxu0 %v2132_v56 }
 0x1d1   :  { %1891 = vmatprep.subr.bf16.mxu1 %v2279_v0  ;;  %1873 = vmatprep.subr.bf16.mxu0 %v2279_v0 }
 0x1d4   :  { %1892 = vmatpush3.bf16.msra.mxu1 %v2132_v56  ;;  %1874 = vmatpush3.bf16.msra.mxu0 %v2133_v57 }
 0x1d5   :  { %1893 = vmatprep.subr.bf16.mxu1 %v2279_v0  ;;  %1899 = vmatprep.subr.bf16.mxu0 %v2279_v0 }
 0x1d8   :  { %1894 = vmatpush3.bf16.msra.mxu1 %v2133_v57  ;;  %v2150_v57 = vld [vmem:[#allocation7 + $0x100] sm:$0xff]  }
 0x1d9   :  { %1919 = vmatprep.subr.bf16.mxu1 %v2279_v0 }
 0x28a   :  { %v341_v59 = vpop.f32.mrb[4].mxu0 }
 0x28b   :  { %v342_v60 = vadd.f32 %v1566_v58, %v341_v59  ;;  %v1837_v61 = vpop.f32.mrb[5].mxu0 }
 0x28c   :  { %v344_v62 = vpop.f32.mrb[6].mxu0 }
 0x28d   :  { %v387_v63 = vmul.f32 0.2, %v342_v60  ;;  %v1838_v1 = vpop.f32.mrb[7].mxu0  ;;  %v2151_v62 = vld [vmem:[#allocation7 + $0x108] sm:$0xff]  }
 0x28e   :  { %v381_v2 = vpop.f32.mrb[4].mxu1  ;;  %v2152_v1 = vld [vmem:[#allocation7 + $0x110] sm:$0xff]  }
 0x28f   :  { %v388_v3 = vmax.f32 %v342_v60, %v387_v63  ;;  %v382_v4 = vadd.f32 %v1566_v58, %v381_v2  ;;  %v1857_v5 = vpop.f32.mrb[5].mxu1  ;;  %v2153_v2 = vld [vmem:[#allocation7 + $0x118] sm:$0xff]  }
 0x290   :  { %v384_v6 = vpop.f32.mrb[6].mxu1  ;;  %v2156_v5 = vld [vmem:[#allocation7 + $0x130] sm:$0xff]  }
 0x291   :  { %v389_v8 = vpack.c.bf16 %v388_v3, %v388_v3  ;;  %v390_v9 = vmul.f32 0.2, %v382_v4  ;;  %v1858_v10 = vpop.f32.mrb[7].mxu1  ;;  %v2154_v3 = vld [vmem:[#allocation7 + $0x120] sm:$0xff]   ;;  %v2157_v6 = vld [vmem:[#allocation7 + $0x138] sm:$0xff]  }
 0x293   :  { %v391_v11 = vmax.f32 %v382_v4, %v390_v9  ;;  %1876 = vmatmul.mubr.bf16.vlgmr.msra.gmra.mrb[8].mxu0 %v389_v8  ;;  %v2155_v4 = vld [vmem:[#allocation7 + $0x128] sm:$0xff]  }
 0x294   :  { %1900 = vmatpush3.bf16.msra.mxu0 %v2134_v7  ;;  %1915 = vmatprep.mubr.msk.bf16.mxu0 %vm2280_vm0, %v2279_v0 }
 0x295   :  { %v392_v13 = vpack.c.bf16 %v391_v11, %v391_v11  ;;  %1901 = vmatprep.subr.bf16.mxu0 %v2279_v0 }
 0x297   :  { %1896 = vmatmul.mubr.bf16.vlgmr.msra.gmra.mrb[8].mxu1 %v392_v13 }
 0x298   :  { %1902 = vmatpush3.bf16.msra.mxu0 %v2135_v12  ;;  %1920 = vmatpush3.bf16.msra.mxu1 %v2134_v7  ;;  %v1596_v7 = vld [vmem:[%s2552_s3 + $0x4] ss:$0 sm:$0xff] }
 0x299   :  { %1903 = vmatprep.subr.bf16.mxu0 %v2279_v0  ;;  %1921 = vmatprep.subr.bf16.mxu1 %v2279_v0 }
 0x29a   :  { %1935 = vmatprep.mubr.msk.bf16.mxu1 %vm2280_vm0, %v2279_v0 }
 0x29c   :  { %1904 = vmatpush3.bf16.msra.mxu0 %v2136_v14  ;;  %1922 = vmatpush3.bf16.msra.mxu1 %v2135_v12 }
 0x29d   :  { %1905 = vmatprep.subr.bf16.mxu0 %v2279_v0  ;;  %1923 = vmatprep.subr.bf16.mxu1 %v2279_v0 }
 0x2a0   :  { %1906 = vmatpush3.bf16.msra.mxu0 %v2137_v15  ;;  %1924 = vmatpush3.bf16.msra.mxu1 %v2136_v14 }
 0x2a1   :  { %1907 = vmatprep.subr.bf16.mxu0 %v2279_v0  ;;  %1925 = vmatprep.subr.bf16.mxu1 %v2279_v0 }
 0x2a4   :  { %1908 = vmatpush3.bf16.msra.mxu0 %v2138_v16  ;;  %1926 = vmatpush3.bf16.msra.mxu1 %v2137_v15 }
 0x2a5   :  { %1909 = vmatprep.subr.bf16.mxu0 %v2279_v0  ;;  %1927 = vmatprep.subr.bf16.mxu1 %v2279_v0 }
 0x2a8   :  { %1910 = vmatpush3.bf16.msra.mxu0 %v2139_v17  ;;  %1928 = vmatpush3.bf16.msra.mxu1 %v2138_v16 }
 0x2a9   :  { %1911 = vmatprep.subr.bf16.mxu0 %v2279_v0  ;;  %1929 = vmatprep.subr.bf16.mxu1 %v2279_v0 }
 0x2ac   :  { %1930 = vmatpush3.bf16.msra.mxu1 %v2139_v17  ;;  %1912 = vmatpush3.bf16.msra.mxu0 %v2140_v18 }
 0x2ad   :  { %1931 = vmatprep.subr.bf16.mxu1 %v2279_v0  ;;  %1913 = vmatprep.subr.bf16.mxu0 %v2279_v0 }
 0x2b0   :  { %1932 = vmatpush3.bf16.msra.mxu1 %v2140_v18  ;;  %1914 = vmatpush3.bf16.msra.mxu0 %v2141_v19 }
 0x2b1   :  { %1933 = vmatprep.subr.bf16.mxu1 %v2279_v0  ;;  %1939 = vmatprep.subr.bf16.mxu0 %v2279_v0 }
 0x2b4   :  { %1934 = vmatpush3.bf16.msra.mxu1 %v2141_v19  ;;  %v2158_v19 = vld [vmem:[#allocation7 + $0x140] sm:$0xff]  }
 0x2b5   :  { %1959 = vmatprep.subr.bf16.mxu1 %v2279_v0 }
 0x366   :  { %v500_v21 = vpop.f32.mrb[8].mxu0 }
 0x367   :  { %v501_v22 = vadd.f32 %v1576_v20, %v500_v21  ;;  %v1877_v23 = vpop.f32.mrb[9].mxu0 }
 0x368   :  { %v503_v24 = vpop.f32.mrb[10].mxu0 }
 0x369   :  { %v546_v25 = vmul.f32 0.2, %v501_v22  ;;  %v1878_v26 = vpop.f32.mrb[11].mxu0  ;;  %v2159_v24 = vld [vmem:[#allocation7 + $0x148] sm:$0xff]  }
 0x36a   :  { %v540_v27 = vpop.f32.mrb[8].mxu1  ;;  %v2160_v26 = vld [vmem:[#allocation7 + $0x150] sm:$0xff]  }
 0x36b   :  { %v547_v28 = vmax.f32 %v501_v22, %v546_v25  ;;  %v541_v29 = vadd.f32 %v1576_v20, %v540_v27  ;;  %v1897_v30 = vpop.f32.mrb[9].mxu1  ;;  %v2161_v27 = vld [vmem:[#allocation7 + $0x158] sm:$0xff]  }
 0x36c   :  { %v543_v31 = vpop.f32.mrb[10].mxu1  ;;  %v2164_v30 = vld [vmem:[#allocation7 + $0x170] sm:$0xff]  }
 0x36d   :  { %v548_v33 = vpack.c.bf16 %v547_v28, %v547_v28  ;;  %v549_v34 = vmul.f32 0.2, %v541_v29  ;;  %v1898_v35 = vpop.f32.mrb[11].mxu1  ;;  %v2162_v28 = vld [vmem:[#allocation7 + $0x160] sm:$0xff]   ;;  %v2165_v31 = vld [vmem:[#allocation7 + $0x178] sm:$0xff]  }
 0x36f   :  { %v550_v36 = vmax.f32 %v541_v29, %v549_v34  ;;  %1916 = vmatmul.mubr.bf16.vlgmr.msra.gmra.mrb[12].mxu0 %v548_v33  ;;  %v2163_v29 = vld [vmem:[#allocation7 + $0x168] sm:$0xff]  }
 0x370   :  { %1940 = vmatpush3.bf16.msra.mxu0 %v2142_v32  ;;  %1955 = vmatprep.mubr.msk.bf16.mxu0 %vm2280_vm0, %v2279_v0 }
 0x371   :  { %v551_v38 = vpack.c.bf16 %v550_v36, %v550_v36  ;;  %1941 = vmatprep.subr.bf16.mxu0 %v2279_v0 }
 0x373   :  { %1936 = vmatmul.mubr.bf16.vlgmr.msra.gmra.mrb[12].mxu1 %v551_v38 }
 0x374   :  { %1942 = vmatpush3.bf16.msra.mxu0 %v2143_v37  ;;  %1960 = vmatpush3.bf16.msra.mxu1 %v2142_v32  ;;  %v1606_v32 = vld [vmem:[%s2552_s3 + $0x5] ss:$0 sm:$0xff] }
 0x375   :  { %1943 = vmatprep.subr.bf16.mxu0 %v2279_v0  ;;  %1961 = vmatprep.subr.bf16.mxu1 %v2279_v0 }
 0x376   :  { %1975 = vmatprep.mubr.msk.bf16.mxu1 %vm2280_vm0, %v2279_v0 }
 0x378   :  { %1944 = vmatpush3.bf16.msra.mxu0 %v2144_v39  ;;  %1962 = vmatpush3.bf16.msra.mxu1 %v2143_v37 }
 0x379   :  { %1945 = vmatprep.subr.bf16.mxu0 %v2279_v0  ;;  %1963 = vmatprep.subr.bf16.mxu1 %v2279_v0 }
 0x37c   :  { %1946 = vmatpush3.bf16.msra.mxu0 %v2145_v40  ;;  %1964 = vmatpush3.bf16.msra.mxu1 %v2144_v39 }
 0x37d   :  { %1947 = vmatprep.subr.bf16.mxu0 %v2279_v0  ;;  %1965 = vmatprep.subr.bf16.mxu1 %v2279_v0 }
 0x380   :  { %1948 = vmatpush3.bf16.msra.mxu0 %v2146_v41  ;;  %1966 = vmatpush3.bf16.msra.mxu1 %v2145_v40 }
 0x381   :  { %1949 = vmatprep.subr.bf16.mxu0 %v2279_v0  ;;  %1967 = vmatprep.subr.bf16.mxu1 %v2279_v0 }
 0x384   :  { %1950 = vmatpush3.bf16.msra.mxu0 %v2147_v42  ;;  %1968 = vmatpush3.bf16.msra.mxu1 %v2146_v41 }
 0x385   :  { %1951 = vmatprep.subr.bf16.mxu0 %v2279_v0  ;;  %1969 = vmatprep.subr.bf16.mxu1 %v2279_v0 }
 0x388   :  { %1970 = vmatpush3.bf16.msra.mxu1 %v2147_v42  ;;  %1952 = vmatpush3.bf16.msra.mxu0 %v2148_v43 }
 0x389   :  { %1971 = vmatprep.subr.bf16.mxu1 %v2279_v0  ;;  %1953 = vmatprep.subr.bf16.mxu0 %v2279_v0 }
 0x38c   :  { %1972 = vmatpush3.bf16.msra.mxu1 %v2148_v43  ;;  %1954 = vmatpush3.bf16.msra.mxu0 %v2149_v44 }
 0x38d   :  { %1973 = vmatprep.subr.bf16.mxu1 %v2279_v0  ;;  %1979 = vmatprep.subr.bf16.mxu0 %v2279_v0 }
 0x390   :  { %1974 = vmatpush3.bf16.msra.mxu1 %v2149_v44  ;;  %v2166_v44 = vld [vmem:[#allocation7 + $0x180] sm:$0xff]  }
 0x391   :  { %1999 = vmatprep.subr.bf16.mxu1 %v2279_v0 }
 0x442   :  { %v659_v46 = vpop.f32.mrb[12].mxu0 }
 0x443   :  { %v660_v47 = vadd.f32 %v1586_v45, %v659_v46  ;;  %v1917_v48 = vpop.f32.mrb[13].mxu0 }
 0x444   :  { %v662_v49 = vpop.f32.mrb[14].mxu0 }
 0x445   :  { %v705_v50 = vmul.f32 0.2, %v660_v47  ;;  %v1918_v51 = vpop.f32.mrb[15].mxu0  ;;  %v2167_v49 = vld [vmem:[#allocation7 + $0x188] sm:$0xff]  }
 0x446   :  { %v699_v52 = vpop.f32.mrb[12].mxu1  ;;  %v2168_v51 = vld [vmem:[#allocation7 + $0x190] sm:$0xff]  }
 0x447   :  { %v706_v53 = vmax.f32 %v660_v47, %v705_v50  ;;  %v700_v54 = vadd.f32 %v1586_v45, %v699_v52  ;;  %v1937_v55 = vpop.f32.mrb[13].mxu1  ;;  %v2169_v52 = vld [vmem:[#allocation7 + $0x198] sm:$0xff]  }
 0x448   :  { %v702_v56 = vpop.f32.mrb[14].mxu1  ;;  %v2172_v55 = vld [vmem:[#allocation7 + $0x1b0] sm:$0xff]  }
 0x449   :  { %v707_v58 = vpack.c.bf16 %v706_v53, %v706_v53  ;;  %v708_v59 = vmul.f32 0.2, %v700_v54  ;;  %v1938_v60 = vpop.f32.mrb[15].mxu1  ;;  %v2170_v53 = vld [vmem:[#allocation7 + $0x1a0] sm:$0xff]   ;;  %v2173_v56 = vld [vmem:[#allocation7 + $0x1b8] sm:$0xff]  }
 0x44b   :  { %v709_v61 = vmax.f32 %v700_v54, %v708_v59  ;;  %1956 = vmatmul.mubr.bf16.vlgmr.msra.gmra.mrb[16].mxu0 %v707_v58  ;;  %v2171_v54 = vld [vmem:[#allocation7 + $0x1a8] sm:$0xff]  }
 0x44c   :  { %1980 = vmatpush3.bf16.msra.mxu0 %v2150_v57  ;;  %1995 = vmatprep.mubr.msk.bf16.mxu0 %vm2280_vm0, %v2279_v0 }
 0x44d   :  { %v710_v63 = vpack.c.bf16 %v709_v61, %v709_v61  ;;  %1981 = vmatprep.subr.bf16.mxu0 %v2279_v0 }
 0x44f   :  { %1976 = vmatmul.mubr.bf16.vlgmr.msra.gmra.mrb[16].mxu1 %v710_v63 }
 0x450   :  { %1982 = vmatpush3.bf16.msra.mxu0 %v2151_v62  ;;  %2000 = vmatpush3.bf16.msra.mxu1 %v2150_v57  ;;  %v1616_v57 = vld [vmem:[%s2552_s3 + $0x6] ss:$0 sm:$0xff] }
 0x451   :  { %1983 = vmatprep.subr.bf16.mxu0 %v2279_v0  ;;  %2001 = vmatprep.subr.bf16.mxu1 %v2279_v0 }
 0x452   :  { %2015 = vmatprep.mubr.msk.bf16.mxu1 %vm2280_vm0, %v2279_v0 }
 0x454   :  { %1984 = vmatpush3.bf16.msra.mxu0 %v2152_v1  ;;  %2002 = vmatpush3.bf16.msra.mxu1 %v2151_v62 }
 0x455   :  { %1985 = vmatprep.subr.bf16.mxu0 %v2279_v0  ;;  %2003 = vmatprep.subr.bf16.mxu1 %v2279_v0 }
 0x458   :  { %1986 = vmatpush3.bf16.msra.mxu0 %v2153_v2  ;;  %2004 = vmatpush3.bf16.msra.mxu1 %v2152_v1 }
 0x459   :  { %1987 = vmatprep.subr.bf16.mxu0 %v2279_v0  ;;  %2005 = vmatprep.subr.bf16.mxu1 %v2279_v0 }
 0x45c   :  { %1988 = vmatpush3.bf16.msra.mxu0 %v2154_v3  ;;  %2006 = vmatpush3.bf16.msra.mxu1 %v2153_v2 }
 0x45d   :  { %1989 = vmatprep.subr.bf16.mxu0 %v2279_v0  ;;  %2007 = vmatprep.subr.bf16.mxu1 %v2279_v0 }
 0x460   :  { %1990 = vmatpush3.bf16.msra.mxu0 %v2155_v4  ;;  %2008 = vmatpush3.bf16.msra.mxu1 %v2154_v3 }
 0x461   :  { %1991 = vmatprep.subr.bf16.mxu0 %v2279_v0  ;;  %2009 = vmatprep.subr.bf16.mxu1 %v2279_v0 }
 0x464   :  { %2010 = vmatpush3.bf16.msra.mxu1 %v2155_v4  ;;  %1992 = vmatpush3.bf16.msra.mxu0 %v2156_v5 }
 0x465   :  { %2011 = vmatprep.subr.bf16.mxu1 %v2279_v0  ;;  %1993 = vmatprep.subr.bf16.mxu0 %v2279_v0 }
 0x468   :  { %2012 = vmatpush3.bf16.msra.mxu1 %v2156_v5  ;;  %1994 = vmatpush3.bf16.msra.mxu0 %v2157_v6 }
 0x469   :  { %2013 = vmatprep.subr.bf16.mxu1 %v2279_v0  ;;  %2019 = vmatprep.subr.bf16.mxu0 %v2279_v0 }
 0x46c   :  { %2014 = vmatpush3.bf16.msra.mxu1 %v2157_v6 }
 0x46d   :  { %2039 = vmatprep.subr.bf16.mxu1 %v2279_v0 }
 0x51e   :  { %v818_v8 = vpop.f32.mrb[16].mxu0 }
 0x51f   :  { %v819_v9 = vadd.f32 %v1596_v7, %v818_v8  ;;  %v1957_v10 = vpop.f32.mrb[17].mxu0 }
 0x520   :  { %v821_v11 = vpop.f32.mrb[18].mxu0  ;;  %v2281_v10 = vmov 1966171168  }
 0x521   :  { %v864_v12 = vmul.f32 0.2, %v819_v9  ;;  %v1958_v13 = vpop.f32.mrb[19].mxu0  ;;  %v1344_v11 = vunpack.c.l.s4 %v2281_v10 }
 0x522   :  { %v858_v14 = vpop.f32.mrb[16].mxu1 }
 0x523   :  { %v865_v15 = vmax.f32 %v819_v9, %v864_v12  ;;  %v859_v16 = vadd.f32 %v1596_v7, %v858_v14  ;;  %v1977_v17 = vpop.f32.mrb[17].mxu1  ;;  %v1346_v12 = vlaneseq  ;;  %v1345_v13 = vunpack.c.0.s8 %v1344_v11 }
 0x524   :  { %v861_v18 = vpop.f32.mrb[18].mxu1 }
 0x525   :  { %v866_v20 = vpack.c.bf16 %v865_v15, %v865_v15  ;;  %v867_v21 = vmul.f32 0.2, %v859_v16  ;;  %v1978_v22 = vpop.f32.mrb[19].mxu1  ;;  %v1347_v14 = vshrl.u32 %v1346_v12, 7  ;;  %v1626_v15 = vld [vmem:[%s2552_s3 + $0x7] ss:$0 sm:$0xff] }
 0x526   :  { %s2282_s3 = smov [#allocation8]  }
 0x527   :  { %v868_v23 = vmax.f32 %v859_v16, %v867_v21  ;;  %1996 = vmatmul.mubr.bf16.vlgmr.msra.gmra.mrb[20].mxu0 %v866_v20  ;;  %v1348_v16 = vsub.s32 %v1345_v13, %v1347_v14  ;;  %s1543_s17 = sshll.u32 %s2282_s3, 4  ;;  %s1544_s17 = int_to_ptr.vmem [resolvable:$true] %s1543_s17 }
 0x528   :  { %2020 = vmatpush3.bf16.msra.mxu0 %v2158_v19  ;;  %2035 = vmatprep.mubr.msk.bf16.mxu0 %vm2280_vm0, %v2279_v0  ;;  %s2244_s18 = scalar_lea.vmem %s1544_s17, 1024  ;;  %p2249_p11 = scmp.lt.s32.totalorder %s1544_s17, %s1544_s17 }
 0x529   :  { %v869_v25 = vpack.c.bf16 %v868_v23, %v868_v23  ;;  %2021 = vmatprep.subr.bf16.mxu0 %v2279_v0  ;;  %p2245_p10 = scmp.ne.s32.totalorder %s1544_s17, %s2244_s18  ;;  %p2250_p12 = scmp.lt.s32.totalorder %s2244_s18, %s2244_s18 }
 0x52b   :  { %2016 = vmatmul.mubr.bf16.vlgmr.msra.gmra.mrb[20].mxu1 %v869_v25  ;;  %p2251_p13 = por %p2250_p12, %p2249_p11 }
 0x52c   :  { %2022 = vmatpush3.bf16.msra.mxu0 %v2159_v24  ;;  %2040 = vmatpush3.bf16.msra.mxu1 %v2158_v19 }
 0x52d   :  { %2023 = vmatprep.subr.bf16.mxu0 %v2279_v0  ;;  %2041 = vmatprep.subr.bf16.mxu1 %v2279_v0  ;;  %p2252_p0 = pnand %p2251_p13, %p2245_p10 }
 0x52e   :  { %2055 = vmatprep.mubr.msk.bf16.mxu1 %vm2280_vm0, %v2279_v0 }
 0x530   :  { %2024 = vmatpush3.bf16.msra.mxu0 %v2160_v26  ;;  %2042 = vmatpush3.bf16.msra.mxu1 %v2159_v24  ;;  %v1393_v24 = vsub.s32 0, %v1347_v14 }
 0x531   :  { %2025 = vmatprep.subr.bf16.mxu0 %v2279_v0  ;;  %2043 = vmatprep.subr.bf16.mxu1 %v2279_v0 }
 0x534   :  { %2026 = vmatpush3.bf16.msra.mxu0 %v2161_v27  ;;  %2044 = vmatpush3.bf16.msra.mxu1 %v2160_v26 }
 0x535   :  { %2027 = vmatprep.subr.bf16.mxu0 %v2279_v0  ;;  %2045 = vmatprep.subr.bf16.mxu1 %v2279_v0 }
 0x538   :  { %2028 = vmatpush3.bf16.msra.mxu0 %v2162_v28  ;;  %2046 = vmatpush3.bf16.msra.mxu1 %v2161_v27 }
 0x539   :  { %2029 = vmatprep.subr.bf16.mxu0 %v2279_v0  ;;  %2047 = vmatprep.subr.bf16.mxu1 %v2279_v0 }
 0x53c   :  { %2030 = vmatpush3.bf16.msra.mxu0 %v2163_v29  ;;  %2048 = vmatpush3.bf16.msra.mxu1 %v2162_v28 }
 0x53d   :  { %2031 = vmatprep.subr.bf16.mxu0 %v2279_v0  ;;  %2049 = vmatprep.subr.bf16.mxu1 %v2279_v0 }
 0x540   :  { %2050 = vmatpush3.bf16.msra.mxu1 %v2163_v29  ;;  %2032 = vmatpush3.bf16.msra.mxu0 %v2164_v30 }
 0x541   :  { %2051 = vmatprep.subr.bf16.mxu1 %v2279_v0  ;;  %2033 = vmatprep.subr.bf16.mxu0 %v2279_v0 }
 0x544   :  { %2052 = vmatpush3.bf16.msra.mxu1 %v2164_v30  ;;  %2034 = vmatpush3.bf16.msra.mxu0 %v2165_v31 }
 0x545   :  { %2053 = vmatprep.subr.bf16.mxu1 %v2279_v0  ;;  %2059 = vmatprep.subr.bf16.mxu0 %v2279_v0 }
 0x548   :  { %2054 = vmatpush3.bf16.msra.mxu1 %v2165_v31 }
 0x549   :  { %2079 = vmatprep.subr.bf16.mxu1 %v2279_v0 }
 0x5fa   :  { %v977_v33 = vpop.f32.mrb[20].mxu0 }
 0x5fb   :  { %v978_v34 = vadd.f32 %v1606_v32, %v977_v33  ;;  %v1997_v35 = vpop.f32.mrb[21].mxu0 }
 0x5fc   :  { %v980_v36 = vpop.f32.mrb[22].mxu0 }
 0x5fd   :  { %v1023_v37 = vmul.f32 0.2, %v978_v34  ;;  %v1998_v38 = vpop.f32.mrb[23].mxu0 }
 0x5fe   :  { %v1017_v39 = vpop.f32.mrb[20].mxu1 }
 0x5ff   :  { %v1024_v40 = vmax.f32 %v978_v34, %v1023_v37  ;;  %v1018_v41 = vadd.f32 %v1606_v32, %v1017_v39  ;;  %v2017_v42 = vpop.f32.mrb[21].mxu1 }
 0x600   :  { %v1020_v43 = vpop.f32.mrb[22].mxu1 }
 0x601   :  { %v1025_v45 = vpack.c.bf16 %v1024_v40, %v1024_v40  ;;  %v1026_v46 = vmul.f32 0.2, %v1018_v41  ;;  %v2018_v47 = vpop.f32.mrb[23].mxu1 }
 0x603   :  { %v1027_v48 = vmax.f32 %v1018_v41, %v1026_v46  ;;  %2036 = vmatmul.mubr.bf16.vlgmr.msra.gmra.mrb[24].mxu0 %v1025_v45 }
 0x604   :  { %2060 = vmatpush3.bf16.msra.mxu0 %v2166_v44  ;;  %2075 = vmatprep.mubr.msk.bf16.mxu0 %vm2280_vm0, %v2279_v0 }
 0x605   :  { %v1028_v50 = vpack.c.bf16 %v1027_v48, %v1027_v48  ;;  %2061 = vmatprep.subr.bf16.mxu0 %v2279_v0 }
 0x607   :  { %2056 = vmatmul.mubr.bf16.vlgmr.msra.gmra.mrb[24].mxu1 %v1028_v50 }
 0x608   :  { %2062 = vmatpush3.bf16.msra.mxu0 %v2167_v49  ;;  %2080 = vmatpush3.bf16.msra.mxu1 %v2166_v44 }
 0x609   :  { %2063 = vmatprep.subr.bf16.mxu0 %v2279_v0  ;;  %2081 = vmatprep.subr.bf16.mxu1 %v2279_v0 }
 0x60a   :  { %2095 = vmatprep.mubr.msk.bf16.mxu1 %vm2280_vm0, %v2279_v0 }
 0x60c   :  { %2064 = vmatpush3.bf16.msra.mxu0 %v2168_v51  ;;  %2082 = vmatpush3.bf16.msra.mxu1 %v2167_v49 }
 0x60d   :  { %2065 = vmatprep.subr.bf16.mxu0 %v2279_v0  ;;  %2083 = vmatprep.subr.bf16.mxu1 %v2279_v0 }
 0x610   :  { %2066 = vmatpush3.bf16.msra.mxu0 %v2169_v52  ;;  %2084 = vmatpush3.bf16.msra.mxu1 %v2168_v51 }
 0x611   :  { %2067 = vmatprep.subr.bf16.mxu0 %v2279_v0  ;;  %2085 = vmatprep.subr.bf16.mxu1 %v2279_v0 }
 0x614   :  { %2068 = vmatpush3.bf16.msra.mxu0 %v2170_v53  ;;  %2086 = vmatpush3.bf16.msra.mxu1 %v2169_v52 }
 0x615   :  { %2069 = vmatprep.subr.bf16.mxu0 %v2279_v0  ;;  %2087 = vmatprep.subr.bf16.mxu1 %v2279_v0 }
 0x618   :  { %2070 = vmatpush3.bf16.msra.mxu0 %v2171_v54  ;;  %2088 = vmatpush3.bf16.msra.mxu1 %v2170_v53 }
 0x619   :  { %2071 = vmatprep.subr.bf16.mxu0 %v2279_v0  ;;  %2089 = vmatprep.subr.bf16.mxu1 %v2279_v0 }
 0x61c   :  { %2090 = vmatpush3.bf16.msra.mxu1 %v2171_v54  ;;  %2072 = vmatpush3.bf16.msra.mxu0 %v2172_v55 }
 0x61d   :  { %2091 = vmatprep.subr.bf16.mxu1 %v2279_v0  ;;  %2073 = vmatprep.subr.bf16.mxu0 %v2279_v0 }
 0x620   :  { %2092 = vmatpush3.bf16.msra.mxu1 %v2172_v55  ;;  %2074 = vmatpush3.bf16.msra.mxu0 %v2173_v56 }
 0x621   :  { %2093 = vmatprep.subr.bf16.mxu1 %v2279_v0 }
 0x624   :  { %2094 = vmatpush3.bf16.msra.mxu1 %v2173_v56 }
 0x6d6   :  { %v1136_v58 = vpop.f32.mrb[24].mxu0 }
 0x6d7   :  { %v1137_v59 = vadd.f32 %v1616_v57, %v1136_v58  ;;  %v2037_v60 = vpop.f32.mrb[25].mxu0 }
 0x6d8   :  { %v1139_v61 = vpop.f32.mrb[26].mxu0 }
 0x6d9   :  { %v1182_v62 = vmul.f32 0.2, %v1137_v59  ;;  %v2038_v63 = vpop.f32.mrb[27].mxu0 }
 0x6da   :  { %v1176_v1 = vpop.f32.mrb[24].mxu1 }
 0x6db   :  { %v1183_v2 = vmax.f32 %v1137_v59, %v1182_v62  ;;  %v1177_v3 = vadd.f32 %v1616_v57, %v1176_v1  ;;  %v2057_v4 = vpop.f32.mrb[25].mxu1 }
 0x6dc   :  { %v1179_v5 = vpop.f32.mrb[26].mxu1 }
 0x6dd   :  { %v1184_v6 = vpack.c.bf16 %v1183_v2, %v1183_v2  ;;  %v1185_v0 = vmul.f32 0.2, %v1177_v3  ;;  %v2058_v7 = vpop.f32.mrb[27].mxu1 }
 0x6df   :  { %v1186_v8 = vmax.f32 %v1177_v3, %v1185_v0  ;;  %2076 = vmatmul.mubr.bf16.vlgmr.msra.gmra.mrb[28].mxu0 %v1184_v6 }
 0x6e1   :  { %v1187_v9 = vpack.c.bf16 %v1186_v8, %v1186_v8 }
 0x6e3   :  { %2096 = vmatmul.mubr.bf16.vlgmr.msra.gmra.mrb[28].mxu1 %v1187_v9 }
 0x7b2   :  { %v1295_v17 = vpop.f32.mrb[28].mxu0 }
 0x7b3   :  { %v1296_v18 = vadd.f32 %v1626_v15, %v1295_v17  ;;  %v2077_v19 = vpop.f32.mrb[29].mxu0 }
 0x7b4   :  { %v1298_v20 = vpop.f32.mrb[30].mxu0 }
 0x7b5   :  { %v1342_v21 = vcombine.high %v1296_v18, %v1296_v18  ;;  %v1349_v22 = vrot.slane %v1296_v18, %v1348_v16  ;;  %v2078_v23 = vpop.f32.mrb[31].mxu0 }
 0x7b6   :  { %v1335_v25 = vpop.f32.mrb[28].mxu1 }
 0x7b7   :  { %v1356_v26 = vrot.slane %v1342_v21, %v1348_v16  ;;  %v1357_v27 = vcombine.high %v1349_v22, %v1349_v22  ;;  %v1365_v28 = vrot.slane %v1349_v22, %v1348_v16  ;;  %v1336_v29 = vadd.f32 %v1626_v15, %v1335_v25  ;;  %v2097_v30 = vpop.f32.mrb[29].mxu1 }
 0x7b8   :  { %v1338_v31 = vpop.f32.mrb[30].mxu1 }
 0x7b9   :  { %v1358_v32 = vcombine.high %v1356_v26, %v1356_v26  ;;  %v1372_v33 = vrot.slane %v1356_v26, %v1348_v16  ;;  %v1379_v34 = vrot.slane %v1357_v27, %v1348_v16  ;;  %v1387_v35 = vcombine.high %v1365_v28, %v1365_v28  ;;  %v2098_v36 = vpop.f32.mrb[31].mxu1 }
 0x7ba   :  { %v1394_v37 = vrot.slane %v1365_v28, %v1393_v24  ;;  %v1440_v38 = vcombine.high %v1336_v29, %v1336_v29  ;;  %v1447_v39 = vrot.slane %v1336_v29, %v1348_v16 }
 0x7bb   :  { %v1386_v40 = vrot.slane %v1358_v32, %v1348_v16  ;;  %v1388_v41 = vcombine.high %v1372_v33, %v1372_v33  ;;  %v1389_v42 = vcombine.high %v1379_v34, %v1379_v34  ;;  %v1398_v43 = vrot.slane %v1379_v34, %v1393_v24 }
 0x7bc   :  { %v1402_v44 = vrot.slane %v1387_v35, %v1393_v24  ;;  %v1410_v45 = vrot.slane %v1372_v33, %v1393_v24  ;;  %1431 = vst [vmem:[#allocation8] sm:$0xf] %v1394_v37  ;;  %v1454_v46 = vrot.slane %v1440_v38, %v1348_v16  ;;  %v1455_v47 = vcombine.high %v1447_v39, %v1447_v39 }
 0x7bd   :  { %v1390_v48 = vcombine.high %v1386_v40, %v1386_v40  ;;  %v1406_v49 = vrot.slane %v1389_v42, %v1393_v24  ;;  %v1414_v50 = vrot.slane %v1386_v40, %v1393_v24  ;;  %v1418_v51 = vrot.slane %v1388_v41, %v1393_v24  ;;  %1432 = vst [vmem:[#allocation8 + $0x4] sm:$0xf] %v1398_v43 }
 0x7be   :  { %1433 = vst [vmem:[#allocation8 + $0x8] sm:$0xf] %v1402_v44  ;;  %1435 = vst [vmem:[#allocation8 + $0x10] sm:$0xf] %v1410_v45  ;;  %v1456_v52 = vcombine.high %v1454_v46, %v1454_v46  ;;  %v1463_v53 = vrot.slane %v1447_v39, %v1348_v16  ;;  %v1470_v54 = vrot.slane %v1454_v46, %v1348_v16 }
 0x7bf   :  { %v1477_v55 = vrot.slane %v1455_v47, %v1348_v16  ;;  %v1422_v56 = vrot.slane %v1390_v48, %v1393_v24  ;;  %1434 = vst [vmem:[#allocation8 + $0xc] sm:$0xf] %v1406_v49  ;;  %1436 = vst [vmem:[#allocation8 + $0x14] sm:$0xf] %v1414_v50 }
 0x7c0   :  { %1437 = vst [vmem:[#allocation8 + $0x18] sm:$0xf] %v1418_v51  ;;  %v1484_v57 = vrot.slane %v1456_v52, %v1348_v16  ;;  %v1485_v58 = vcombine.high %v1463_v53, %v1463_v53  ;;  %v1486_v59 = vcombine.high %v1470_v54, %v1470_v54  ;;  %v1492_v61 = vrot.slane %v1463_v53, %v1393_v24 }
 0x7c1   :  { %v1487_v60 = vcombine.high %v1477_v55, %v1477_v55  ;;  %1438 = vst [vmem:[#allocation8 + $0x1c] sm:$0xf] %v1422_v56  ;;  %v1496_v62 = vrot.slane %v1477_v55, %v1393_v24  ;;  %v1508_v63 = vrot.slane %v1470_v54, %v1393_v24 }
 0x7c2   :  { %v1488_v1 = vcombine.high %v1484_v57, %v1484_v57  ;;  %v1500_v2 = vrot.slane %v1485_v58, %v1393_v24  ;;  %v1512_v4 = vrot.slane %v1484_v57, %v1393_v24  ;;  %v1516_v5 = vrot.slane %v1486_v59, %v1393_v24  ;;  %1530 = vst [vmem:[#allocation8 + $0x20] sm:$0xf] %v1492_v61 }
 0x7c3   :  { %v1504_v3 = vrot.slane %v1487_v60, %v1393_v24  ;;  %1531 = vst [vmem:[#allocation8 + $0x24] sm:$0xf] %v1496_v62  ;;  %1534 = vst [vmem:[#allocation8 + $0x30] sm:$0xf] %v1508_v63 }
 0x7c4   :  { %v1520_v6 = vrot.slane %v1488_v1, %v1393_v24  ;;  %1532 = vst [vmem:[#allocation8 + $0x28] sm:$0xf] %v1500_v2  ;;  %1535 = vst [vmem:[#allocation8 + $0x34] sm:$0xf] %v1512_v4 }
 0x7c5   :  { %1533 = vst [vmem:[#allocation8 + $0x2c] sm:$0xf] %v1504_v3  ;;  %1536 = vst [vmem:[#allocation8 + $0x38] sm:$0xf] %v1516_v5 }
 0x7c6   :  { %1537 = vst [vmem:[#allocation8 + $0x3c] sm:$0xf] %v1520_v6 }
 0x7c7   :  { %2255 = shalt.err (!%p2252_p0)
}
 0x7c8   :  { %s2256_s21 = scalar_lea.hbm %s2553_s4, 1024 }
 0x7c9   :  { %p2257_p1 = scmp.ne.s32.totalorder %s2553_s4, %s2256_s21  ;;  %p2260_p2 = scmp.lt.u32.totalorder %s2256_s21, %s2553_s4 }
 0x7cb   :  { %p2262_p3 = pnand %p2260_p2, %p2257_p1 }
 0x7cd   :  { %2265 = shalt.err (!%p2262_p3)
}
 0x7ce   :  { %1549 = dma.vmem_to_hbm [thread:$0]  %s1544_s17, 1024, %s2553_s4, [#allocation4], %s2273_s25, %s2273_s25, %s2274_s26  }
 0x7cf   :  { %2270 = dma.done.wait [#allocation4], 1024  }
 0x7d0   :  { %2271 = vsyncadd [#allocation4], 4294966272 }
 0x7d1   :  { %1553 = vsyncpa [#allocation3], 1 }
 0x7d2   :  { %1554 = vsyncpa [#allocation6], 1 }
 0x7d3   :  { %1555 = vsyncpa [#allocation4], 1 }

</bundles_post_ra>
